<compile_context>
chip_gen: v7x
topology: tpu7x:2x2x1
jax: 0.10.0
libtpu: 0.0.40
codegen_flags: <defaults>
</compile_context>

<pallas_src>
import jax
import jax.numpy as jnp
from jax import lax
from jax.experimental import pallas as pl
from jax.experimental.pallas import tpu as pltpu

EPS = 1e-5


def _fold_bn_into_conv(w, bn):
    """Fold eval-mode BatchNorm1d into a bias-free 1x1 Conv1d."""
    gamma, beta, mean, var = bn
    scale = gamma / jnp.sqrt(var + EPS)                            # (out,)
    w_eff = (w * scale[:, None]).astype(jnp.float32)               # (out, in)
    b_eff = (beta - mean * scale)[:, None].astype(jnp.float32)     # (out, 1)
    return w_eff, b_eff


def axial_layer_cross(x, y, params, *, num_heads, kernel_size, height_dim=True,
                      block_cols=None):
    B, C, H, W = x.shape
    nh = num_heads
    dh = C // nh
    dhh = dh // 2
    K = kernel_size
    assert C % nh == 0 and dh % 2 == 0

    # ---- glue: lane-dense slab layout (channels, slice*position) -------------
    if height_dim:
        slab_x = jnp.transpose(x, (1, 0, 3, 2)).reshape(C, B * W * H)   # col = (b*W+w)*H + h
        slab_y = jnp.transpose(y, (1, 0, 3, 2)).reshape(C, B * W * H)
        attended = H
    else:
        slab_x = jnp.transpose(x, (1, 0, 2, 3)).reshape(C, B * H * W)   # col = (b*H+h)*W + w
        slab_y = jnp.transpose(y, (1, 0, 2, 3)).reshape(C, B * H * W)
        attended = W
    assert attended == K, "kernel_size must equal the attended spatial dimension"
    NK = slab_x.shape[1]

    # Lane-block width: smallest multiple of 128 that divides N*K.  Smaller L
    # keeps the block-diagonal (L, L) matmul waste low (total logits flops scale
    # linearly with L), while >=128 keeps every load/store unmasked lane-dense.
    if block_cols is not None:
        L = block_cols
    else:
        L = NK
        for cand in (128, 256, 384, 512):
            if cand % K == 0 and NK % cand == 0:
                L = cand
                break
    assert L % K == 0 and NK % L == 0
    reps = L // K

    # ---- glue: fold BNs, fuse the three 1x1 convs into one weight ------------
    wk, bk = _fold_bn_into_conv(params["k_conv_w"], params["k_bn"])
    wq, bq = _fold_bn_into_conv(params["q_conv_w"], params["q_bn"])
    # NB: the PyTorch forward normalizes v with kq_bn (v_bn / kq_conv are unused).
    wv, bv = _fold_bn_into_conv(params["v_conv_w"], params["kq_bn"])

    zero_h = jnp.zeros((C // 2, C), jnp.float32)
    zero_f = jnp.zeros((C, C), jnp.float32)
    # Fused weight over stacked [x; y; 1]: rows are in torch kqv order [k, q, v].
    w_all = jnp.concatenate([
        jnp.concatenate([wk, zero_h, bk], axis=1),     # k = Wk @ x + bk
        jnp.concatenate([zero_h, wq, bq], axis=1),     # q = Wq @ y + bq
        jnp.concatenate([wv, zero_f, bv], axis=1),     # v = Wv @ x + bv (kq_bn folded)
    ], axis=0)                                         # (2C, 2C+1)

    z = jnp.concatenate(
        [slab_x.astype(jnp.float32), slab_y.astype(jnp.float32),
         jnp.ones((1, NK), jnp.float32)], axis=0)      # (2C+1, NK)

    # ---- glue: relative encodings tiled into lane-dense layouts --------------
    dist = (jnp.arange(K)[None, :] - jnp.arange(K)[:, None] + K - 1).reshape(-1)
    rel = params["rel_encoding"][:, dist].reshape(2 * dh, K, K).astype(jnp.float32)
    q_enc, k_enc, v_enc = rel[:dhh], rel[dhh:dh], rel[dh:]

    qe = jnp.tile(q_enc.reshape(dhh * K, K), (1, reps))     # [(d,x'), p] = qenc[d, x', p%K]
    ke = jnp.tile(k_enc.reshape(dhh * K, K), (1, reps))     # [(d,y'), p] = kenc[d, y', p%K]
    ve = jnp.tile(v_enc.reshape(dh * K, K), (1, reps))      # [(d,x'), p] = venc[d, x', p%K]
    sel = jnp.tile(jnp.eye(K, dtype=jnp.float32), (1, reps))        # [x', p] = (x' == p%K)
    blk = jnp.arange(L) // K
    mneg = jnp.where(blk[:, None] == blk[None, :], 0.0, -1e30).astype(jnp.float32)  # (L, L)

    lg, lb, lm, lv = params["logits_bn"]
    l_scale = (lg / jnp.sqrt(lv + EPS)).reshape(3, nh).astype(jnp.float32)
    # BN shifts are per-(group, head) constants -> cancelled by the row softmax.

    c_rows = (((0,), (0,)), ((), ()))    # contract leading (feature) dim of both -> (L, L)
    c_lanes = (((1,), (1,)), ((), ()))   # contract lane dim of both

    # ---- Pallas kernel: one lane-block (L/K axial slices) per grid step -------
    def kernel(z_ref, w_ref, sel_ref, qe_ref, ke_ref, ve_ref, mneg_ref, lsc_ref, o_ref):
        # Fused QKV 1x1 convs (+ folded BN) for every slice in the block: one matmul.
        kqv = jnp.dot(w_ref[...], z_ref[...],
                      preferred_element_type=jnp.float32)            # (2C, L)

        sel_m = sel_ref[...]          # (K, L)
        qe_m = qe_ref[...]            # (dhh*K, L)
        ke_m = ke_ref[...]            # (dhh*K, L)
        ve_m = ve_ref[...]            # (dh*K, L)
        mneg_m = mneg_ref[...]        # (L, L) block-diagonal mask (0 / -1e30)

        head_outs = []
        for h in range(nh):                      # unrolled; nh is small/static
            base = 2 * dh * h                    # torch reshape head-channel quirk
            k_h = kqv[base: base + dhh]          # (dhh, L)
            q_h = kqv[base + dhh: base + dh]     # (dhh, L)
            v_h = kqv[base + dh: base + 2 * dh]  # (dh,  L)

            # per-(group, head) BN scales folded into the matmul operands
            q_qk = lsc_ref[0, h] * q_h
            q_exp = ((lsc_ref[1, h] * q_h)[:, None, :] * sel_m[None, :, :]
                     ).reshape(dhh * K, L)       # q expanded over x'
            k_exp = ((lsc_ref[2, h] * k_h)[:, None, :] * sel_m[None, :, :]
                     ).reshape(dhh * K, L)       # k expanded over y'

            # one fused dot_general -> ls0*qk + ls1*qr + ls2*kr for every slice
            row = jnp.concatenate([q_exp, ke_m, q_qk], axis=0)       # (dhh*(2K+1), L)
            col = jnp.concatenate([qe_m, k_exp, k_h], axis=0)        # (dhh*(2K+1), L)
            logits = lax.dot_general(row, col, c_rows,
                                     preferred_element_type=jnp.float32) + mneg_m  # (L, L)

            # row softmax over the K valid (same-slice) columns
            logits = logits - jnp.max(logits, axis=-1, keepdims=True)
            e = jnp.exp(logits)                                       # off-diag -> exactly 0
            wgt = e * pl.reciprocal(jnp.sum(e, axis=-1, keepdims=True), approx=False)

            # attention + positional attention in one lane-contracting dot_general
            va = jnp.concatenate([ve_m, v_h], axis=0)                 # (dh*K + dh, L)
            r = lax.dot_general(va, wgt, c_lanes,
                                preferred_element_type=jnp.float32)   # (dh*K + dh, L)
            attn_enc = jnp.sum(r[:dh * K].reshape(dh, K, L) * sel_m[None, :, :], axis=1)
            attn = r[dh * K: dh * K + dh]                             # (dh, L)

            head_outs.append(attn + attn_enc)                         # (dh, L)

        # single lane-dense (C, L) store per grid step (no sub-sublane masked writes)
        o_ref[...] = jnp.concatenate(head_outs, axis=0).astype(o_ref.dtype)

    out_slab = pl.pallas_call(
        kernel,
        out_shape=jax.ShapeDtypeStruct((C, NK), jnp.float32),
        grid=(NK // L,),
        in_specs=[
            pl.BlockSpec((2 * C + 1, L), lambda j: (0, j)),          # z block (lane-dense)
            pl.BlockSpec((2 * C, 2 * C + 1), lambda j: (0, 0)),      # fused QKV weight
            pl.BlockSpec((K, L), lambda j: (0, 0)),                  # selection mask
            pl.BlockSpec((dhh * K, L), lambda j: (0, 0)),            # q rel-encoding (tiled)
            pl.BlockSpec((dhh * K, L), lambda j: (0, 0)),            # k rel-encoding (tiled)
            pl.BlockSpec((dh * K, L), lambda j: (0, 0)),             # v rel-encoding (tiled)
            pl.BlockSpec((L, L), lambda j: (0, 0)),                  # block-diag -inf mask
            pl.BlockSpec(memory_space=pltpu.MemorySpace.SMEM),       # logits_bn scales (3, nh)
        ],
        out_specs=pl.BlockSpec((C, L), lambda j: (0, j)),            # lane-dense output block
        compiler_params=pltpu.CompilerParams(dimension_semantics=("parallel",)),
    )(z, w_all, sel, qe, ke, ve, mneg, l_scale)

    if height_dim:
        return out_slab.reshape(C, B, W, H).transpose(1, 0, 3, 2)    # -> (B, C, H, W)
    else:
        return out_slab.reshape(C, B, H, W).transpose(1, 0, 2, 3)    # -> (B, C, H, W)


# ---- pure-JAX reference mirroring the PyTorch forward (eval-mode BN) ----------
def reference_forward(x, y, params, *, num_heads, kernel_size, height_dim=True):
    B, C, H, W = x.shape
    nh, K = num_heads, kernel_size
    dh = C // nh
    dhh = dh // 2
    if height_dim:
        xp = jnp.transpose(x, (0, 3, 1, 2))
        yp = jnp.transpose(y, (0, 3, 1, 2))
    else:
        xp = jnp.transpose(x, (0, 2, 1, 3))
        yp = jnp.transpose(y, (0, 2, 1, 3))
    Bn, Wd, D, Ht = xp.shape
    xp = xp.reshape(Bn * Wd, D, Ht)
    yp = yp.reshape(Bn * Wd, D, Ht)

    def bn1d(t, p):
        g, b, m, v = p
        return (t - m[None, :, None]) / jnp.sqrt(v[None, :, None] + EPS) * g[None, :, None] + b[None, :, None]

    k = bn1d(jnp.einsum('oc,ncl->nol', params["k_conv_w"], xp), params["k_bn"])
    v_ = bn1d(jnp.einsum('oc,ncl->nol', params["v_conv_w"], xp), params["kq_bn"])
    q = bn1d(jnp.einsum('oc,ncl->nol', params["q_conv_w"], yp), params["q_bn"])
    kqv = jnp.concatenate([k, q, v_], axis=1).reshape(Bn * Wd, nh, 2 * dh, Ht)
    k, q, v_ = kqv[:, :, :dhh], kqv[:, :, dhh:dh], kqv[:, :, dh:]

    dist = (jnp.arange(K)[None, :] - jnp.arange(K)[:, None] + K - 1).reshape(-1)
    rel = params["rel_encoding"][:, dist].reshape(2 * dh, K, K)
    q_enc, k_enc, v_enc = rel[:dhh], rel[dhh:dh], rel[dh:]

    qk = jnp.einsum('nhdx,nhdy->nhxy', q, k)
    qr = jnp.einsum('nhdx,dxy->nhxy', q, q_enc)
    kr = jnp.einsum('nhdx,dxy->nhxy', k, k_enc).transpose(0, 1, 3, 2)
    logits = jnp.concatenate([qk, qr, kr], axis=1)
    lg, lb, lm, lv = params["logits_bn"]
    logits = (logits - lm[None, :, None, None]) / jnp.sqrt(lv[None, :, None, None] + EPS) \
             * lg[None, :, None, None] + lb[None, :, None, None]
    logits = logits.reshape(Bn * Wd, 3, nh, Ht, Ht).sum(axis=1)
    w = jax.nn.softmax(logits, axis=3)
    attn = jnp.einsum('nhxy,nhdy->nhdx', w, v_)
    attn_enc = jnp.einsum('nhxy,dxy->nhdx', w, v_enc)
    attn_out = jnp.concatenate([attn, attn_enc], axis=-1).reshape(Bn * Wd, 2 * D, Ht)
    out = attn_out.reshape(Bn, Wd, D, 2, Ht).sum(axis=-2)
    if height_dim:
        return jnp.transpose(out, (0, 2, 3, 1))
    return jnp.transpose(out, (0, 2, 1, 3))


if __name__ == "__main__":
    B, C, Hdim, Wdim = 2, 16, 8, 8
    num_heads, kernel_size = 4, 8          # kernel_size == attended dim (H)
    dh = C // num_heads

    key = jax.random.PRNGKey(0)
    keys = jax.random.split(key, 12)

    def bn_params(k, c):
        k1, k2, k3, k4 = jax.random.split(k, 4)
        gamma = 1.0 + 0.1 * jax.random.normal(k1, (c,), jnp.float32)
        beta = 0.1 * jax.random.normal(k2, (c,), jnp.float32)
        mean = 0.1 * jax.random.normal(k3, (c,), jnp.float32)
        var = 1.0 + 0.1 * jax.random.uniform(k4, (c,), jnp.float32)
        return gamma, beta, mean, var

    params = {
        "k_conv_w": 0.1 * jax.random.normal(keys[0], (C // 2, C), jnp.float32),
        "q_conv_w": 0.1 * jax.random.normal(keys[1], (C // 2, C), jnp.float32),
        "v_conv_w": 0.1 * jax.random.normal(keys[2], (C, C), jnp.float32),
        "rel_encoding": jax.random.normal(keys[3], (2 * dh, 2 * kernel_size - 1), jnp.float32),
        "k_bn": bn_params(keys[4], C // 2),
        "q_bn": bn_params(keys[5], C // 2),
        "kq_bn": bn_params(keys[6], C),
        "logits_bn": bn_params(keys[7], 3 * num_heads),
    }
    # TODO(synk): v_bn and kq_conv exist in the PyTorch module but are never used in
    # its forward pass (v is normalized by kq_bn), so they are intentionally omitted.

    x = jax.random.normal(keys[8], (B, C, Hdim, Wdim), jnp.float32)
    y = jax.random.normal(keys[9], (B, C, Hdim, Wdim), jnp.float32)

    out = axial_layer_cross(x, y, params, num_heads=num_heads,
                            kernel_size=kernel_size, height_dim=True)
    out = jax.block_until_ready(out)

    ref = reference_forward(x, y, params, num_heads=num_heads,
                            kernel_size=kernel_size, height_dim=True)
    assert out.shape == (B, C, Hdim, Wdim)
    assert jnp.allclose(out, ref, rtol=1e-3, atol=1e-3), float(jnp.max(jnp.abs(out - ref)))
    print("KERNEL_OK")
</pallas_src>

<mosaic_0001>
module attributes {stable_mosaic.version = 11 : i64} {
  func.func @kernel(%arg0: i32, %arg1: memref<33x128xf32, #tpu.memory_space<vmem>>, %arg2: memref<32x33xf32, #tpu.memory_space<vmem>>, %arg3: memref<8x128xf32, #tpu.memory_space<vmem>>, %arg4: memref<16x128xf32, #tpu.memory_space<vmem>>, %arg5: memref<16x128xf32, #tpu.memory_space<vmem>>, %arg6: memref<32x128xf32, #tpu.memory_space<vmem>>, %arg7: memref<128x128xf32, #tpu.memory_space<vmem>>, %arg8: memref<3x4xf32, #tpu.memory_space<smem>>, %arg9: memref<16x128xf32, #tpu.memory_space<vmem>>) attributes {dimension_semantics = [#tpu.dimension_semantics<parallel>], iteration_bounds = array<i64: 1>, scalar_prefetch = 0 : i64, scratch_operands = 0 : i64, tpu.core_type = #tpu.core_type<tc>, window_params = [{transform_indices = @transform_0, window_bounds = array<i64: 33, 128>}, {pipeline_mode = #tpu.pipeline_mode<synchronous>, transform_indices = @transform_1, window_bounds = array<i64: 32, 33>}, {pipeline_mode = #tpu.pipeline_mode<synchronous>, transform_indices = @transform_2, window_bounds = array<i64: 8, 128>}, {pipeline_mode = #tpu.pipeline_mode<synchronous>, transform_indices = @transform_3, window_bounds = array<i64: 16, 128>}, {pipeline_mode = #tpu.pipeline_mode<synchronous>, transform_indices = @transform_4, window_bounds = array<i64: 16, 128>}, {pipeline_mode = #tpu.pipeline_mode<synchronous>, transform_indices = @transform_5, window_bounds = array<i64: 32, 128>}, {pipeline_mode = #tpu.pipeline_mode<synchronous>, transform_indices = @transform_6, window_bounds = array<i64: 128, 128>}, {transform_indices = @transform_7, window_bounds = array<i64: 3, 4>}, {transform_indices = @transform_8, window_bounds = array<i64: 16, 128>}]} {
    %c0 = arith.constant 0 : index
    %c0_0 = arith.constant 0 : index
    %0 = vector.load %arg2[%c0, %c0_0] : memref<32x33xf32, #tpu.memory_space<vmem>>, vector<32x33xf32>
    %c0_1 = arith.constant 0 : index
    %c0_2 = arith.constant 0 : index
    %1 = vector.load %arg1[%c0_1, %c0_2] : memref<33x128xf32, #tpu.memory_space<vmem>>, vector<33x128xf32>
    %cst = arith.constant dense<0.000000e+00> : vector<32x128xf32>
    %2 = tpu.matmul %0, %1, %cst {dimension_numbers = #tpu.dot_dimension_numbers<[1], [0], [0], [1], [0, 0, 1, 1], [], []>} : vector<32x33xf32>, vector<33x128xf32>, vector<32x128xf32> -> vector<32x128xf32>
    %c0_3 = arith.constant 0 : index
    %c0_4 = arith.constant 0 : index
    %3 = vector.load %arg3[%c0_3, %c0_4] : memref<8x128xf32, #tpu.memory_space<vmem>>, vector<8x128xf32>
    %c0_5 = arith.constant 0 : index
    %c0_6 = arith.constant 0 : index
    %4 = vector.load %arg4[%c0_5, %c0_6] : memref<16x128xf32, #tpu.memory_space<vmem>>, vector<16x128xf32>
    %c0_7 = arith.constant 0 : index
    %c0_8 = arith.constant 0 : index
    %5 = vector.load %arg5[%c0_7, %c0_8] : memref<16x128xf32, #tpu.memory_space<vmem>>, vector<16x128xf32>
    %c0_9 = arith.constant 0 : index
    %c0_10 = arith.constant 0 : index
    %6 = vector.load %arg6[%c0_9, %c0_10] : memref<32x128xf32, #tpu.memory_space<vmem>>, vector<32x128xf32>
    %c0_11 = arith.constant 0 : index
    %c0_12 = arith.constant 0 : index
    %7 = vector.load %arg7[%c0_11, %c0_12] : memref<128x128xf32, #tpu.memory_space<vmem>>, vector<128x128xf32>
    %8 = vector.extract_strided_slice %2 {offsets = [0, 0], sizes = [2, 128], strides = [1, 1]} : vector<32x128xf32> to vector<2x128xf32>
    %9 = vector.extract_strided_slice %2 {offsets = [2, 0], sizes = [2, 128], strides = [1, 1]} : vector<32x128xf32> to vector<2x128xf32>
    %10 = vector.extract_strided_slice %2 {offsets = [4, 0], sizes = [4, 128], strides = [1, 1]} : vector<32x128xf32> to vector<4x128xf32>
    %c0_13 = arith.constant 0 : index
    %c0_14 = arith.constant 0 : index
    %11 = memref.load %arg8[%c0_13, %c0_14] : memref<3x4xf32, #tpu.memory_space<smem>>
    %12 = vector.broadcast %11 : f32 to vector<2x128xf32>
    %13 = arith.mulf %12, %9 : vector<2x128xf32>
    %c1 = arith.constant 1 : index
    %c0_15 = arith.constant 0 : index
    %14 = memref.load %arg8[%c1, %c0_15] : memref<3x4xf32, #tpu.memory_space<smem>>
    %15 = vector.broadcast %14 : f32 to vector<2x128xf32>
    %16 = arith.mulf %15, %9 : vector<2x128xf32>
    %17 = vector.shape_cast %16 : vector<2x128xf32> to vector<2x1x128xf32>
    %18 = vector.shape_cast %3 : vector<8x128xf32> to vector<1x8x128xf32>
    %19 = vector.broadcast %17 : vector<2x1x128xf32> to vector<2x8x128xf32>
    %20 = vector.broadcast %18 : vector<1x8x128xf32> to vector<2x8x128xf32>
    %21 = arith.mulf %19, %20 : vector<2x8x128xf32>
    %22 = vector.shape_cast %21 : vector<2x8x128xf32> to vector<16x128xf32>
    %c2 = arith.constant 2 : index
    %c0_16 = arith.constant 0 : index
    %23 = memref.load %arg8[%c2, %c0_16] : memref<3x4xf32, #tpu.memory_space<smem>>
    %24 = vector.broadcast %23 : f32 to vector<2x128xf32>
    %25 = arith.mulf %24, %8 : vector<2x128xf32>
    %26 = vector.shape_cast %25 : vector<2x128xf32> to vector<2x1x128xf32>
    %27 = vector.shape_cast %3 : vector<8x128xf32> to vector<1x8x128xf32>
    %28 = vector.broadcast %26 : vector<2x1x128xf32> to vector<2x8x128xf32>
    %29 = vector.broadcast %27 : vector<1x8x128xf32> to vector<2x8x128xf32>
    %30 = arith.mulf %28, %29 : vector<2x8x128xf32>
    %31 = vector.shape_cast %30 : vector<2x8x128xf32> to vector<16x128xf32>
    %32 = tpu.concatenate %22, %5, %13 in 0 : vector<16x128xf32>, vector<16x128xf32>, vector<2x128xf32> -> vector<34x128xf32>
    %33 = tpu.concatenate %4, %31, %8 in 0 : vector<16x128xf32>, vector<16x128xf32>, vector<2x128xf32> -> vector<34x128xf32>
    %cst_17 = arith.constant dense<0.000000e+00> : vector<128x128xf32>
    %34 = tpu.matmul %32, %33, %cst_17 {dimension_numbers = #tpu.dot_dimension_numbers<[0], [0], [1], [1], [0, 1, 1, 1], [], []>} : vector<34x128xf32>, vector<34x128xf32>, vector<128x128xf32> -> vector<128x128xf32>
    %35 = arith.addf %34, %7 : vector<128x128xf32>
    %cst_18 = arith.constant dense<0xFF800000> : vector<128xf32>
    %36 = vector.multi_reduction <maximumf>, %35, %cst_18 [1] : vector<128x128xf32> to vector<128xf32>
    %37 = vector.shape_cast %36 : vector<128xf32> to vector<128x1xf32>
    %38 = vector.broadcast %37 : vector<128x1xf32> to vector<128x128xf32>
    %39 = arith.subf %35, %38 : vector<128x128xf32>
    %40 = math.exp %39 : vector<128x128xf32>
    %cst_19 = arith.constant dense<0.000000e+00> : vector<128xf32>
    %41 = vector.multi_reduction <add>, %40, %cst_19 [1] : vector<128x128xf32> to vector<128xf32>
    %42 = vector.shape_cast %41 : vector<128xf32> to vector<128x1xf32>
    %43 = tpu.reciprocal %42 : vector<128x1xf32> -> vector<128x1xf32>
    %44 = vector.broadcast %43 : vector<128x1xf32> to vector<128x128xf32>
    %45 = arith.mulf %40, %44 : vector<128x128xf32>
    %46 = tpu.concatenate %6, %10 in 0 : vector<32x128xf32>, vector<4x128xf32> -> vector<36x128xf32>
    %cst_20 = arith.constant dense<0.000000e+00> : vector<36x128xf32>
    %47 = tpu.matmul %46, %45, %cst_20 {dimension_numbers = #tpu.dot_dimension_numbers<[1], [1], [0], [0], [0, 0, 1, 0], [], []>} : vector<36x128xf32>, vector<128x128xf32>, vector<36x128xf32> -> vector<36x128xf32>
    %48 = vector.extract_strided_slice %47 {offsets = [0, 0], sizes = [32, 128], strides = [1, 1]} : vector<36x128xf32> to vector<32x128xf32>
    %49 = vector.shape_cast %48 : vector<32x128xf32> to vector<4x8x128xf32>
    %50 = vector.shape_cast %3 : vector<8x128xf32> to vector<1x8x128xf32>
    %51 = vector.broadcast %50 : vector<1x8x128xf32> to vector<4x8x128xf32>
    %52 = arith.mulf %49, %51 : vector<4x8x128xf32>
    %cst_21 = arith.constant dense<0.000000e+00> : vector<4x128xf32>
    %53 = vector.multi_reduction <add>, %52, %cst_21 [1] : vector<4x8x128xf32> to vector<4x128xf32>
    %54 = vector.extract_strided_slice %47 {offsets = [32, 0], sizes = [4, 128], strides = [1, 1]} : vector<36x128xf32> to vector<4x128xf32>
    %55 = arith.addf %54, %53 : vector<4x128xf32>
    %56 = vector.extract_strided_slice %2 {offsets = [8, 0], sizes = [2, 128], strides = [1, 1]} : vector<32x128xf32> to vector<2x128xf32>
    %57 = vector.extract_strided_slice %2 {offsets = [10, 0], sizes = [2, 128], strides = [1, 1]} : vector<32x128xf32> to vector<2x128xf32>
    %58 = vector.extract_strided_slice %2 {offsets = [12, 0], sizes = [4, 128], strides = [1, 1]} : vector<32x128xf32> to vector<4x128xf32>
    %c0_22 = arith.constant 0 : index
    %c1_23 = arith.constant 1 : index
    %59 = memref.load %arg8[%c0_22, %c1_23] : memref<3x4xf32, #tpu.memory_space<smem>>
    %60 = vector.broadcast %59 : f32 to vector<2x128xf32>
    %61 = arith.mulf %60, %57 : vector<2x128xf32>
    %c1_24 = arith.constant 1 : index
    %c1_25 = arith.constant 1 : index
    %62 = memref.load %arg8[%c1_24, %c1_25] : memref<3x4xf32, #tpu.memory_space<smem>>
    %63 = vector.broadcast %62 : f32 to vector<2x128xf32>
    %64 = arith.mulf %63, %57 : vector<2x128xf32>
    %65 = vector.shape_cast %64 : vector<2x128xf32> to vector<2x1x128xf32>
    %66 = vector.shape_cast %3 : vector<8x128xf32> to vector<1x8x128xf32>
    %67 = vector.broadcast %65 : vector<2x1x128xf32> to vector<2x8x128xf32>
    %68 = vector.broadcast %66 : vector<1x8x128xf32> to vector<2x8x128xf32>
    %69 = arith.mulf %67, %68 : vector<2x8x128xf32>
    %70 = vector.shape_cast %69 : vector<2x8x128xf32> to vector<16x128xf32>
    %c2_26 = arith.constant 2 : index
    %c1_27 = arith.constant 1 : index
    %71 = memref.load %arg8[%c2_26, %c1_27] : memref<3x4xf32, #tpu.memory_space<smem>>
    %72 = vector.broadcast %71 : f32 to vector<2x128xf32>
    %73 = arith.mulf %72, %56 : vector<2x128xf32>
    %74 = vector.shape_cast %73 : vector<2x128xf32> to vector<2x1x128xf32>
    %75 = vector.shape_cast %3 : vector<8x128xf32> to vector<1x8x128xf32>
    %76 = vector.broadcast %74 : vector<2x1x128xf32> to vector<2x8x128xf32>
    %77 = vector.broadcast %75 : vector<1x8x128xf32> to vector<2x8x128xf32>
    %78 = arith.mulf %76, %77 : vector<2x8x128xf32>
    %79 = vector.shape_cast %78 : vector<2x8x128xf32> to vector<16x128xf32>
    %80 = tpu.concatenate %70, %5, %61 in 0 : vector<16x128xf32>, vector<16x128xf32>, vector<2x128xf32> -> vector<34x128xf32>
    %81 = tpu.concatenate %4, %79, %56 in 0 : vector<16x128xf32>, vector<16x128xf32>, vector<2x128xf32> -> vector<34x128xf32>
    %cst_28 = arith.constant dense<0.000000e+00> : vector<128x128xf32>
    %82 = tpu.matmul %80, %81, %cst_28 {dimension_numbers = #tpu.dot_dimension_numbers<[0], [0], [1], [1], [0, 1, 1, 1], [], []>} : vector<34x128xf32>, vector<34x128xf32>, vector<128x128xf32> -> vector<128x128xf32>
    %83 = arith.addf %82, %7 : vector<128x128xf32>
    %cst_29 = arith.constant dense<0xFF800000> : vector<128xf32>
    %84 = vector.multi_reduction <maximumf>, %83, %cst_29 [1] : vector<128x128xf32> to vector<128xf32>
    %85 = vector.shape_cast %84 : vector<128xf32> to vector<128x1xf32>
    %86 = vector.broadcast %85 : vector<128x1xf32> to vector<128x128xf32>
    %87 = arith.subf %83, %86 : vector<128x128xf32>
    %88 = math.exp %87 : vector<128x128xf32>
    %cst_30 = arith.constant dense<0.000000e+00> : vector<128xf32>
    %89 = vector.multi_reduction <add>, %88, %cst_30 [1] : vector<128x128xf32> to vector<128xf32>
    %90 = vector.shape_cast %89 : vector<128xf32> to vector<128x1xf32>
    %91 = tpu.reciprocal %90 : vector<128x1xf32> -> vector<128x1xf32>
    %92 = vector.broadcast %91 : vector<128x1xf32> to vector<128x128xf32>
    %93 = arith.mulf %88, %92 : vector<128x128xf32>
    %94 = tpu.concatenate %6, %58 in 0 : vector<32x128xf32>, vector<4x128xf32> -> vector<36x128xf32>
    %cst_31 = arith.constant dense<0.000000e+00> : vector<36x128xf32>
    %95 = tpu.matmul %94, %93, %cst_31 {dimension_numbers = #tpu.dot_dimension_numbers<[1], [1], [0], [0], [0, 0, 1, 0], [], []>} : vector<36x128xf32>, vector<128x128xf32>, vector<36x128xf32> -> vector<36x128xf32>
    %96 = vector.extract_strided_slice %95 {offsets = [0, 0], sizes = [32, 128], strides = [1, 1]} : vector<36x128xf32> to vector<32x128xf32>
    %97 = vector.shape_cast %96 : vector<32x128xf32> to vector<4x8x128xf32>
    %98 = vector.shape_cast %3 : vector<8x128xf32> to vector<1x8x128xf32>
    %99 = vector.broadcast %98 : vector<1x8x128xf32> to vector<4x8x128xf32>
    %100 = arith.mulf %97, %99 : vector<4x8x128xf32>
    %cst_32 = arith.constant dense<0.000000e+00> : vector<4x128xf32>
    %101 = vector.multi_reduction <add>, %100, %cst_32 [1] : vector<4x8x128xf32> to vector<4x128xf32>
    %102 = vector.extract_strided_slice %95 {offsets = [32, 0], sizes = [4, 128], strides = [1, 1]} : vector<36x128xf32> to vector<4x128xf32>
    %103 = arith.addf %102, %101 : vector<4x128xf32>
    %104 = vector.extract_strided_slice %2 {offsets = [16, 0], sizes = [2, 128], strides = [1, 1]} : vector<32x128xf32> to vector<2x128xf32>
    %105 = vector.extract_strided_slice %2 {offsets = [18, 0], sizes = [2, 128], strides = [1, 1]} : vector<32x128xf32> to vector<2x128xf32>
    %106 = vector.extract_strided_slice %2 {offsets = [20, 0], sizes = [4, 128], strides = [1, 1]} : vector<32x128xf32> to vector<4x128xf32>
    %c0_33 = arith.constant 0 : index
    %c2_34 = arith.constant 2 : index
    %107 = memref.load %arg8[%c0_33, %c2_34] : memref<3x4xf32, #tpu.memory_space<smem>>
    %108 = vector.broadcast %107 : f32 to vector<2x128xf32>
    %109 = arith.mulf %108, %105 : vector<2x128xf32>
    %c1_35 = arith.constant 1 : index
    %c2_36 = arith.constant 2 : index
    %110 = memref.load %arg8[%c1_35, %c2_36] : memref<3x4xf32, #tpu.memory_space<smem>>
    %111 = vector.broadcast %110 : f32 to vector<2x128xf32>
    %112 = arith.mulf %111, %105 : vector<2x128xf32>
    %113 = vector.shape_cast %112 : vector<2x128xf32> to vector<2x1x128xf32>
    %114 = vector.shape_cast %3 : vector<8x128xf32> to vector<1x8x128xf32>
    %115 = vector.broadcast %113 : vector<2x1x128xf32> to vector<2x8x128xf32>
    %116 = vector.broadcast %114 : vector<1x8x128xf32> to vector<2x8x128xf32>
    %117 = arith.mulf %115, %116 : vector<2x8x128xf32>
    %118 = vector.shape_cast %117 : vector<2x8x128xf32> to vector<16x128xf32>
    %c2_37 = arith.constant 2 : index
    %c2_38 = arith.constant 2 : index
    %119 = memref.load %arg8[%c2_37, %c2_38] : memref<3x4xf32, #tpu.memory_space<smem>>
    %120 = vector.broadcast %119 : f32 to vector<2x128xf32>
    %121 = arith.mulf %120, %104 : vector<2x128xf32>
    %122 = vector.shape_cast %121 : vector<2x128xf32> to vector<2x1x128xf32>
    %123 = vector.shape_cast %3 : vector<8x128xf32> to vector<1x8x128xf32>
    %124 = vector.broadcast %122 : vector<2x1x128xf32> to vector<2x8x128xf32>
    %125 = vector.broadcast %123 : vector<1x8x128xf32> to vector<2x8x128xf32>
    %126 = arith.mulf %124, %125 : vector<2x8x128xf32>
    %127 = vector.shape_cast %126 : vector<2x8x128xf32> to vector<16x128xf32>
    %128 = tpu.concatenate %118, %5, %109 in 0 : vector<16x128xf32>, vector<16x128xf32>, vector<2x128xf32> -> vector<34x128xf32>
    %129 = tpu.concatenate %4, %127, %104 in 0 : vector<16x128xf32>, vector<16x128xf32>, vector<2x128xf32> -> vector<34x128xf32>
    %cst_39 = arith.constant dense<0.000000e+00> : vector<128x128xf32>
    %130 = tpu.matmul %128, %129, %cst_39 {dimension_numbers = #tpu.dot_dimension_numbers<[0], [0], [1], [1], [0, 1, 1, 1], [], []>} : vector<34x128xf32>, vector<34x128xf32>, vector<128x128xf32> -> vector<128x128xf32>
    %131 = arith.addf %130, %7 : vector<128x128xf32>
    %cst_40 = arith.constant dense<0xFF800000> : vector<128xf32>
    %132 = vector.multi_reduction <maximumf>, %131, %cst_40 [1] : vector<128x128xf32> to vector<128xf32>
    %133 = vector.shape_cast %132 : vector<128xf32> to vector<128x1xf32>
    %134 = vector.broadcast %133 : vector<128x1xf32> to vector<128x128xf32>
    %135 = arith.subf %131, %134 : vector<128x128xf32>
    %136 = math.exp %135 : vector<128x128xf32>
    %cst_41 = arith.constant dense<0.000000e+00> : vector<128xf32>
    %137 = vector.multi_reduction <add>, %136, %cst_41 [1] : vector<128x128xf32> to vector<128xf32>
    %138 = vector.shape_cast %137 : vector<128xf32> to vector<128x1xf32>
    %139 = tpu.reciprocal %138 : vector<128x1xf32> -> vector<128x1xf32>
    %140 = vector.broadcast %139 : vector<128x1xf32> to vector<128x128xf32>
    %141 = arith.mulf %136, %140 : vector<128x128xf32>
    %142 = tpu.concatenate %6, %106 in 0 : vector<32x128xf32>, vector<4x128xf32> -> vector<36x128xf32>
    %cst_42 = arith.constant dense<0.000000e+00> : vector<36x128xf32>
    %143 = tpu.matmul %142, %141, %cst_42 {dimension_numbers = #tpu.dot_dimension_numbers<[1], [1], [0], [0], [0, 0, 1, 0], [], []>} : vector<36x128xf32>, vector<128x128xf32>, vector<36x128xf32> -> vector<36x128xf32>
    %144 = vector.extract_strided_slice %143 {offsets = [0, 0], sizes = [32, 128], strides = [1, 1]} : vector<36x128xf32> to vector<32x128xf32>
    %145 = vector.shape_cast %144 : vector<32x128xf32> to vector<4x8x128xf32>
    %146 = vector.shape_cast %3 : vector<8x128xf32> to vector<1x8x128xf32>
    %147 = vector.broadcast %146 : vector<1x8x128xf32> to vector<4x8x128xf32>
    %148 = arith.mulf %145, %147 : vector<4x8x128xf32>
    %cst_43 = arith.constant dense<0.000000e+00> : vector<4x128xf32>
    %149 = vector.multi_reduction <add>, %148, %cst_43 [1] : vector<4x8x128xf32> to vector<4x128xf32>
    %150 = vector.extract_strided_slice %143 {offsets = [32, 0], sizes = [4, 128], strides = [1, 1]} : vector<36x128xf32> to vector<4x128xf32>
    %151 = arith.addf %150, %149 : vector<4x128xf32>
    %152 = vector.extract_strided_slice %2 {offsets = [24, 0], sizes = [2, 128], strides = [1, 1]} : vector<32x128xf32> to vector<2x128xf32>
    %153 = vector.extract_strided_slice %2 {offsets = [26, 0], sizes = [2, 128], strides = [1, 1]} : vector<32x128xf32> to vector<2x128xf32>
    %154 = vector.extract_strided_slice %2 {offsets = [28, 0], sizes = [4, 128], strides = [1, 1]} : vector<32x128xf32> to vector<4x128xf32>
    %c0_44 = arith.constant 0 : index
    %c3 = arith.constant 3 : index
    %155 = memref.load %arg8[%c0_44, %c3] : memref<3x4xf32, #tpu.memory_space<smem>>
    %156 = vector.broadcast %155 : f32 to vector<2x128xf32>
    %157 = arith.mulf %156, %153 : vector<2x128xf32>
    %c1_45 = arith.constant 1 : index
    %c3_46 = arith.constant 3 : index
    %158 = memref.load %arg8[%c1_45, %c3_46] : memref<3x4xf32, #tpu.memory_space<smem>>
    %159 = vector.broadcast %158 : f32 to vector<2x128xf32>
    %160 = arith.mulf %159, %153 : vector<2x128xf32>
    %161 = vector.shape_cast %160 : vector<2x128xf32> to vector<2x1x128xf32>
    %162 = vector.shape_cast %3 : vector<8x128xf32> to vector<1x8x128xf32>
    %163 = vector.broadcast %161 : vector<2x1x128xf32> to vector<2x8x128xf32>
    %164 = vector.broadcast %162 : vector<1x8x128xf32> to vector<2x8x128xf32>
    %165 = arith.mulf %163, %164 : vector<2x8x128xf32>
    %166 = vector.shape_cast %165 : vector<2x8x128xf32> to vector<16x128xf32>
    %c2_47 = arith.constant 2 : index
    %c3_48 = arith.constant 3 : index
    %167 = memref.load %arg8[%c2_47, %c3_48] : memref<3x4xf32, #tpu.memory_space<smem>>
    %168 = vector.broadcast %167 : f32 to vector<2x128xf32>
    %169 = arith.mulf %168, %152 : vector<2x128xf32>
    %170 = vector.shape_cast %169 : vector<2x128xf32> to vector<2x1x128xf32>
    %171 = vector.shape_cast %3 : vector<8x128xf32> to vector<1x8x128xf32>
    %172 = vector.broadcast %170 : vector<2x1x128xf32> to vector<2x8x128xf32>
    %173 = vector.broadcast %171 : vector<1x8x128xf32> to vector<2x8x128xf32>
    %174 = arith.mulf %172, %173 : vector<2x8x128xf32>
    %175 = vector.shape_cast %174 : vector<2x8x128xf32> to vector<16x128xf32>
    %176 = tpu.concatenate %166, %5, %157 in 0 : vector<16x128xf32>, vector<16x128xf32>, vector<2x128xf32> -> vector<34x128xf32>
    %177 = tpu.concatenate %4, %175, %152 in 0 : vector<16x128xf32>, vector<16x128xf32>, vector<2x128xf32> -> vector<34x128xf32>
    %cst_49 = arith.constant dense<0.000000e+00> : vector<128x128xf32>
    %178 = tpu.matmul %176, %177, %cst_49 {dimension_numbers = #tpu.dot_dimension_numbers<[0], [0], [1], [1], [0, 1, 1, 1], [], []>} : vector<34x128xf32>, vector<34x128xf32>, vector<128x128xf32> -> vector<128x128xf32>
    %179 = arith.addf %178, %7 : vector<128x128xf32>
    %cst_50 = arith.constant dense<0xFF800000> : vector<128xf32>
    %180 = vector.multi_reduction <maximumf>, %179, %cst_50 [1] : vector<128x128xf32> to vector<128xf32>
    %181 = vector.shape_cast %180 : vector<128xf32> to vector<128x1xf32>
    %182 = vector.broadcast %181 : vector<128x1xf32> to vector<128x128xf32>
    %183 = arith.subf %179, %182 : vector<128x128xf32>
    %184 = math.exp %183 : vector<128x128xf32>
    %cst_51 = arith.constant dense<0.000000e+00> : vector<128xf32>
    %185 = vector.multi_reduction <add>, %184, %cst_51 [1] : vector<128x128xf32> to vector<128xf32>
    %186 = vector.shape_cast %185 : vector<128xf32> to vector<128x1xf32>
    %187 = tpu.reciprocal %186 : vector<128x1xf32> -> vector<128x1xf32>
    %188 = vector.broadcast %187 : vector<128x1xf32> to vector<128x128xf32>
    %189 = arith.mulf %184, %188 : vector<128x128xf32>
    %190 = tpu.concatenate %6, %154 in 0 : vector<32x128xf32>, vector<4x128xf32> -> vector<36x128xf32>
    %cst_52 = arith.constant dense<0.000000e+00> : vector<36x128xf32>
    %191 = tpu.matmul %190, %189, %cst_52 {dimension_numbers = #tpu.dot_dimension_numbers<[1], [1], [0], [0], [0, 0, 1, 0], [], []>} : vector<36x128xf32>, vector<128x128xf32>, vector<36x128xf32> -> vector<36x128xf32>
    %192 = vector.extract_strided_slice %191 {offsets = [0, 0], sizes = [32, 128], strides = [1, 1]} : vector<36x128xf32> to vector<32x128xf32>
    %193 = vector.shape_cast %192 : vector<32x128xf32> to vector<4x8x128xf32>
    %194 = vector.shape_cast %3 : vector<8x128xf32> to vector<1x8x128xf32>
    %195 = vector.broadcast %194 : vector<1x8x128xf32> to vector<4x8x128xf32>
    %196 = arith.mulf %193, %195 : vector<4x8x128xf32>
    %cst_53 = arith.constant dense<0.000000e+00> : vector<4x128xf32>
    %197 = vector.multi_reduction <add>, %196, %cst_53 [1] : vector<4x8x128xf32> to vector<4x128xf32>
    %198 = vector.extract_strided_slice %191 {offsets = [32, 0], sizes = [4, 128], strides = [1, 1]} : vector<36x128xf32> to vector<4x128xf32>
    %199 = arith.addf %198, %197 : vector<4x128xf32>
    %200 = tpu.concatenate %55, %103, %151, %199 in 0 : vector<4x128xf32>, vector<4x128xf32>, vector<4x128xf32>, vector<4x128xf32> -> vector<16x128xf32>
    %c0_54 = arith.constant 0 : index
    %c0_55 = arith.constant 0 : index
    %201 = vector.load %arg9[%c0_54, %c0_55] : memref<16x128xf32, #tpu.memory_space<vmem>>, vector<16x128xf32>
    tpu.vector_store %arg9[%c0_54, %c0_55], %200 {strides = array<i32>} : memref<16x128xf32, #tpu.memory_space<vmem>>, vector<16x128xf32>,
    return
  }
  func.func @transform_0(%arg0: i32) -> (i32, i32) {
    %c0_i32 = arith.constant 0 : i32
    %c0_i32_0 = arith.constant 0 : i32
    return %c0_i32, %arg0 : i32, i32
  }
  func.func @transform_1(%arg0: i32) -> (i32, i32) {
    %c0_i32 = arith.constant 0 : i32
    %c0_i32_0 = arith.constant 0 : i32
    %c0_i32_1 = arith.constant 0 : i32
    return %c0_i32, %c0_i32_0 : i32, i32
  }
  func.func @transform_2(%arg0: i32) -> (i32, i32) {
    %c0_i32 = arith.constant 0 : i32
    %c0_i32_0 = arith.constant 0 : i32
    %c0_i32_1 = arith.constant 0 : i32
    return %c0_i32, %c0_i32_0 : i32, i32
  }
  func.func @transform_3(%arg0: i32) -> (i32, i32) {
    %c0_i32 = arith.constant 0 : i32
    %c0_i32_0 = arith.constant 0 : i32
    %c0_i32_1 = arith.constant 0 : i32
    return %c0_i32, %c0_i32_0 : i32, i32
  }
  func.func @transform_4(%arg0: i32) -> (i32, i32) {
    %c0_i32 = arith.constant 0 : i32
    %c0_i32_0 = arith.constant 0 : i32
    %c0_i32_1 = arith.constant 0 : i32
    return %c0_i32, %c0_i32_0 : i32, i32
  }
  func.func @transform_5(%arg0: i32) -> (i32, i32) {
    %c0_i32 = arith.constant 0 : i32
    %c0_i32_0 = arith.constant 0 : i32
    %c0_i32_1 = arith.constant 0 : i32
    return %c0_i32, %c0_i32_0 : i32, i32
  }
  func.func @transform_6(%arg0: i32) -> (i32, i32) {
    %c0_i32 = arith.constant 0 : i32
    %c0_i32_0 = arith.constant 0 : i32
    %c0_i32_1 = arith.constant 0 : i32
    return %c0_i32, %c0_i32_0 : i32, i32
  }
  func.func @transform_7(%arg0: i32) -> (i32, i32) {
    %c0_i32 = arith.constant 0 : i32
    %c0_i32_0 = arith.constant 0 : i32
    %c0_i32_1 = arith.constant 0 : i32
    return %c0_i32, %c0_i32_0 : i32, i32
  }
  func.func @transform_8(%arg0: i32) -> (i32, i32) {
    %c0_i32 = arith.constant 0 : i32
    %c0_i32_0 = arith.constant 0 : i32
    return %c0_i32, %arg0 : i32, i32
  }
}

</mosaic_0001>

<bundles_post_ra>
// kernel: tpu_custom_call.1
= control target key start
LH: loop header
LB: loop body
LE: loop exit
PB: predicated region body
PF: predicated region fallthrough
CT: control target
= control target key end

     0   :  { %13 = vsyncpa [#allocation3], 0  ;;  %s4886_s0 = inlined_call_operand.hbm [shape: f32[33,128], index: 0, kind: input, shape index: {}]   ;;  %s4887_s1 = inlined_call_operand.hbm [shape: f32[32,33], index: 1, kind: input, shape index: {}]   ;;  %s4888_s2 = inlined_call_operand.hbm [shape: f32[8,128], index: 2, kind: input, shape index: {}]   ;;  %s4889_s3 = inlined_call_operand.hbm [shape: f32[16,128], index: 3, kind: input, shape index: {}]   ;;  %s4890_s4 = inlined_call_operand.hbm [shape: f32[16,128], index: 4, kind: input, shape index: {}]   ;;  %s4891_s5 = inlined_call_operand.hbm [shape: f32[32,128], index: 5, kind: input, shape index: {}]   ;;  %s4892_s6 = inlined_call_operand.hbm [shape: f32[128,128], index: 6, kind: input, shape index: {}]   ;;  %s4893_s7 = inlined_call_operand.vmem [shape: f32[3,4], index: 7, kind: input, shape index: {}]   ;;  %s4894_s8 = inlined_call_operand.hbm [shape: f32[16,128], index: 8, kind: output, shape index: {}]  }
   0x1   :  { %14 = vsyncpa [#allocation7], 0 }
   0x2   :  { %15 = vsyncpa [#allocation10], 0 }
   0x3   :  { %16 = vsyncpa [#allocation13], 0 }
   0x4   :  { %17 = vsyncpa [#allocation5], 0 }
   0x5   :  { %18 = vsyncpa [#allocation4], 0  ;;  %s3879_s27 = smov [#allocation6]   ;;  %s3880_s29 = smov [#allocation9]  }
   0x6   :  { %s36_s28 = sshll.u32 %s3879_s27, 4  ;;  %s58_s30 = sshll.u32 %s3880_s29, 4  ;;  %s37_s28 = int_to_ptr.vmem [resolvable:$true] %s36_s28  ;;  %s3939_s30 = int_to_ptr.vmem [resolvable:$true] %s58_s30 }
   0x7   :  { %s3679_s11 = scalar_lea.hbm %s4887_s1, 512 }
   0x8   :  { %p3680_p0 = scmp.ne.s32.totalorder %s4887_s1, %s3679_s11  ;;  %p3683_p1 = scmp.lt.u32.totalorder %s3679_s11, %s4887_s1 }
   0xa   :  { %p3685_p2 = pnand %p3683_p1, %p3680_p0 }
   0xc   :  { %3688 = shalt.err (!%p3685_p2)
}
   0xd   :  { %s3689_s16 = scalar_lea.vmem %s37_s28, 512  ;;  %p3694_p4 = scmp.lt.s32.totalorder %s37_s28, %s37_s28 }
   0xe   :  { %p3690_p3 = scmp.ne.s32.totalorder %s37_s28, %s3689_s16  ;;  %p3695_p5 = scmp.lt.s32.totalorder %s3689_s16, %s3689_s16 }
  0x10   :  { %p3696_p6 = por %p3695_p5, %p3694_p4 }
  0x12   :  { %p3697_p7 = pnand %p3696_p6, %p3690_p3 }
  0x14   :  { %3700 = shalt.err (!%p3697_p7)
}
  0x15   :  { %s3881_s17 = smov 128   ;;  %s3882_s18 = smov 8  }
  0x16   :  { %42 = dma.hbm_to_vmem [thread:$0]  %s4887_s1, 512, %s37_s28, [#allocation7], %s3881_s17, %s3881_s17, %s3882_s18  }
  0x17   :  { %s3701_s23 = scalar_lea.hbm %s4889_s3, 256 }
  0x18   :  { %p3702_p8 = scmp.ne.s32.totalorder %s4889_s3, %s3701_s23  ;;  %p3705_p9 = scmp.lt.u32.totalorder %s3701_s23, %s4889_s3 }
  0x1a   :  { %p3707_p10 = pnand %p3705_p9, %p3702_p8 }
  0x1c   :  { %3710 = shalt.err (!%p3707_p10)
}
  0x1d   :  { %s3711_s29 = scalar_lea.vmem %s3939_s30, 256  ;;  %p3716_p12 = scmp.lt.s32.totalorder %s3939_s30, %s3939_s30 }
  0x1e   :  { %p3712_p11 = scmp.ne.s32.totalorder %s3939_s30, %s3711_s29  ;;  %p3717_p13 = scmp.lt.s32.totalorder %s3711_s29, %s3711_s29 }
  0x20   :  { %p3718_p0 = por %p3717_p13, %p3716_p12 }
  0x22   :  { %p3719_p1 = pnand %p3718_p0, %p3712_p11 }
  0x24   :  { %3722 = shalt.err (!%p3719_p1)
}
  0x25   :  { %64 = dma.hbm_to_vmem [thread:$0]  %s4889_s3, 256, %s3939_s30, [#allocation10], %s3881_s17, %s3881_s17, %s3882_s18  }
  0x26   :  { %s3883_s9 = smov [#allocation12]   ;;  %s3884_s11 = smov [#allocation2]  }
  0x27   :  { %s82_s10 = sshll.u32 %s3883_s9, 4  ;;  %s24_s12 = sshll.u32 %s3884_s11, 4  ;;  %s83_s10 = int_to_ptr.vmem [resolvable:$true] %s82_s10  ;;  %s3976_s12 = int_to_ptr.vmem [resolvable:$true] %s24_s12 }
  0x28   :  { %s3723_s15 = scalar_lea.hbm %s4891_s5, 512 }
  0x29   :  { %p3724_p2 = scmp.ne.s32.totalorder %s4891_s5, %s3723_s15  ;;  %p3727_p3 = scmp.lt.u32.totalorder %s3723_s15, %s4891_s5 }
  0x2b   :  { %p3729_p4 = pnand %p3727_p3, %p3724_p2 }
  0x2d   :  { %3732 = shalt.err (!%p3729_p4)
}
  0x2e   :  { %s3733_s3 = scalar_lea.vmem %s83_s10, 512  ;;  %p3738_p6 = scmp.lt.s32.totalorder %s83_s10, %s83_s10 }
  0x2f   :  { %p3734_p5 = scmp.ne.s32.totalorder %s83_s10, %s3733_s3  ;;  %p3739_p7 = scmp.lt.s32.totalorder %s3733_s3, %s3733_s3 }
  0x31   :  { %p3740_p8 = por %p3739_p7, %p3738_p6 }
  0x33   :  { %p3741_p9 = pnand %p3740_p8, %p3734_p5 }
  0x35   :  { %3744 = shalt.err (!%p3741_p9)
}
  0x36   :  { %88 = dma.hbm_to_vmem [thread:$0]  %s4891_s5, 512, %s83_s10, [#allocation13], %s3881_s17, %s3881_s17, %s3882_s18  }
  0x37   :  { %s3745_s25 = scalar_lea.hbm %s4886_s0, 640 }
  0x38   :  { %p3746_p10 = scmp.ne.s32.totalorder %s4886_s0, %s3745_s25  ;;  %p3749_p11 = scmp.lt.u32.totalorder %s3745_s25, %s4886_s0 }
  0x3a   :  { %p3751_p12 = pnand %p3749_p11, %p3746_p10 }
  0x3c   :  { %3754 = shalt.err (!%p3751_p12)
}
  0x3d   :  { %s3755_s28 = scalar_lea.vmem %s3976_s12, 640  ;;  %p3760_p0 = scmp.lt.s32.totalorder %s3976_s12, %s3976_s12 }
  0x3e   :  { %p3756_p13 = scmp.ne.s32.totalorder %s3976_s12, %s3755_s28  ;;  %p3761_p1 = scmp.lt.s32.totalorder %s3755_s28, %s3755_s28 }
  0x40   :  { %p3762_p2 = por %p3761_p1, %p3760_p0 }
  0x42   :  { %p3763_p3 = pnand %p3762_p2, %p3756_p13 }
  0x44   :  { %3766 = shalt.err (!%p3763_p3)
}
  0x45   :  { %30 = dma.hbm_to_vmem [thread:$0]  %s4886_s0, 640, %s3976_s12, [#allocation3], %s3881_s17, %s3881_s17, %s3882_s18  }
  0x46   :  { %s3885_s10 = smov [#allocation8]   ;;  %s3886_s13 = smov [#allocation11]  }
  0x47   :  { %s49_s11 = sshll.u32 %s3885_s10, 4  ;;  %s70_s14 = sshll.u32 %s3886_s13, 4  ;;  %s50_s11 = int_to_ptr.vmem [resolvable:$true] %s49_s11  ;;  %s4013_s14 = int_to_ptr.vmem [resolvable:$true] %s70_s14 }
  0x48   :  { %s3767_s19 = scalar_lea.hbm %s4888_s2, 128 }
  0x49   :  { %p3768_p4 = scmp.ne.s32.totalorder %s4888_s2, %s3767_s19  ;;  %p3771_p5 = scmp.lt.u32.totalorder %s3767_s19, %s4888_s2 }
  0x4b   :  { %p3773_p6 = pnand %p3771_p5, %p3768_p4 }
  0x4d   :  { %3776 = shalt.err (!%p3773_p6)
}
  0x4e   :  { %s3777_s0 = scalar_lea.vmem %s50_s11, 128  ;;  %p3782_p8 = scmp.lt.s32.totalorder %s50_s11, %s50_s11 }
  0x4f   :  { %p3778_p7 = scmp.ne.s32.totalorder %s50_s11, %s3777_s0  ;;  %p3783_p9 = scmp.lt.s32.totalorder %s3777_s0, %s3777_s0 }
  0x51   :  { %p3784_p10 = por %p3783_p9, %p3782_p8 }
  0x53   :  { %p3785_p11 = pnand %p3784_p10, %p3778_p7 }
  0x55   :  { %3788 = shalt.err (!%p3785_p11)
}
  0x56   :  { %52 = dma.hbm_to_vmem [thread:$0]  %s4888_s2, 128, %s50_s11, [#allocation7]  }
  0x57   :  { %s3789_s25 = scalar_lea.hbm %s4890_s4, 256 }
  0x58   :  { %p3790_p12 = scmp.ne.s32.totalorder %s4890_s4, %s3789_s25  ;;  %p3793_p13 = scmp.lt.u32.totalorder %s3789_s25, %s4890_s4 }
  0x5a   :  { %p3795_p0 = pnand %p3793_p13, %p3790_p12 }
  0x5c   :  { %3798 = shalt.err (!%p3795_p0)
}
  0x5d   :  { %s3799_s28 = scalar_lea.vmem %s4013_s14, 256  ;;  %p3804_p2 = scmp.lt.s32.totalorder %s4013_s14, %s4013_s14 }
  0x5e   :  { %p3800_p1 = scmp.ne.s32.totalorder %s4013_s14, %s3799_s28  ;;  %p3805_p3 = scmp.lt.s32.totalorder %s3799_s28, %s3799_s28 }
  0x60   :  { %p3806_p4 = por %p3805_p3, %p3804_p2 }
  0x62   :  { %p3807_p5 = pnand %p3806_p4, %p3800_p1 }
  0x64   :  { %3810 = shalt.err (!%p3807_p5)
}
  0x65   :  { %76 = dma.hbm_to_vmem [thread:$0]  %s4890_s4, 256, %s4013_s14, [#allocation10], %s3881_s17, %s3881_s17, %s3882_s18  }
  0x66   :  { %s107_s11 = sshll.u32 %s4893_s7, 4  ;;  %s3887_s13 = smov [#allocation14]   ;;  %s108_s11 = int_to_ptr.vmem [resolvable:$true] %s107_s11 }
  0x67   :  { %s94_s15 = sshll.u32 %s3887_s13, 4  ;;  %s3811_s20 = scalar_lea.hbm %s4892_s6, 2048  ;;  %s95_s15 = int_to_ptr.vmem [resolvable:$true] %s94_s15 }
  0x68   :  { %p3812_p6 = scmp.ne.s32.totalorder %s4892_s6, %s3811_s20  ;;  %p3815_p7 = scmp.lt.u32.totalorder %s3811_s20, %s4892_s6 }
  0x6a   :  { %p3817_p8 = pnand %p3815_p7, %p3812_p6 }
  0x6c   :  { %3820 = shalt.err (!%p3817_p8)
}
  0x6d   :  { %s3821_s4 = scalar_lea.vmem %s95_s15, 2048  ;;  %p3826_p10 = scmp.lt.s32.totalorder %s95_s15, %s95_s15 }
  0x6e   :  { %p3822_p9 = scmp.ne.s32.totalorder %s95_s15, %s3821_s4  ;;  %p3827_p11 = scmp.lt.s32.totalorder %s3821_s4, %s3821_s4 }
  0x70   :  { %p3828_p12 = por %p3827_p11, %p3826_p10 }
  0x72   :  { %p3829_p13 = pnand %p3828_p12, %p3822_p9 }
  0x74   :  { %3832 = shalt.err (!%p3829_p13)
}
  0x75   :  { %100 = dma.hbm_to_vmem [thread:$0]  %s4892_s6, 2048, %s95_s15, [#allocation13], %s3881_s17, %s3881_s17, %s3882_s18  }
  0x76   :  { %s3833_s12 = scalar_lea.vmem %s108_s11, 64  ;;  %p3838_p1 = scmp.lt.s32.totalorder %s108_s11, %s108_s11 }
  0x77   :  { %p3834_p0 = scmp.ne.s32.totalorder %s108_s11, %s3833_s12  ;;  %p3839_p2 = scmp.lt.s32.totalorder %s3833_s12, %s3833_s12 }
  0x79   :  { %p3840_p3 = por %p3839_p2, %p3838_p1 }
  0x7b   :  { %p3841_p4 = pnand %p3840_p3, %p3834_p0 }
  0x7d   :  { %3844 = shalt.err (!%p3841_p4)
}
  0x7e   :  { %s3888_s22 = smov [#allocation15]  }
  0x7f   :  { %110 = dma.vmem_to_smem %s108_s11, 64, %s3888_s22, [#allocation5]  }
  0x80   :  { %3867 = dma.done.wait [#allocation3], 640  }
  0x81   :  { %3868 = vsyncadd [#allocation3], 4294966656 }
  0x82   :  { %3869 = dma.done.wait [#allocation7], 640  }
  0x83   :  { %3870 = vsyncadd [#allocation7], 4294966656 }
  0x84   :  { %3871 = dma.done.wait [#allocation10], 512  }
  0x85   :  { %3872 = vsyncadd [#allocation10], 4294966784 }
  0x86   :  { %3873 = dma.done.wait [#allocation13], 2560  }
  0x87   :  { %3874 = vsyncadd [#allocation13], 4294964736 }
  0x88   :  { %3875 = dma.done.wait [#allocation5], 64  }
  0x89   :  { %3876 = vsyncadd [#allocation5], 4294967232 }
  0x8a   :  { %135 = sfence }
  0x8b   :  { %v140_v0 = vld [vmem:[#allocation2] sm:$0xff]  ;;  %v141_v1 = vld [vmem:[#allocation2 + $0x8] sm:$0xff]  ;;  %v142_v2 = vld [vmem:[#allocation2 + $0x10] sm:$0xff]  ;;  %vm145_vm0 = vcmask 269312   ;;  %vm158_vm1 = vcmask 1040384   ;;  %s2675_s6 = sld [smem:[#allocation15 + $0x101]]  ;;  %v282_v14 = vlaneseq }
  0x8c   :  { %v3250_v3 = vpack.c.bf16 %v141_v1, %v140_v0  ;;  %v143_v4 = vld [vmem:[#allocation2 + $0x18] sm:$0xff]  ;;  %v136_v5 = vld [vmem:[#allocation6] sm:$0xff]  ;;  %v144_v7 = vld [vmem:[#allocation2 + $0x20] sm:$0x1]  ;;  %s2674_s23 = sld [smem:[#allocation15 + $0x81]]  ;;  %s2655_s24 = sld [smem:[#allocation15 + $0x100]] }
  0x8d   :  { %v3254_v6 = vpack.c.bf16 %v143_v4, %v142_v2  ;;  %2920 = vmatprep.mubr.msk.f32.mxu0 %vm145_vm0, %v136_v5  ;;  %v137_v8 = vld [vmem:[#allocation6 + $0x8] sm:$0xff]  ;;  %v249_v10 = vld [vmem:[#allocation9 + $0x8] sm:$0xff]  ;;  %v3889_v12 = vmov 1966171168   ;;  %s2654_s25 = sld [smem:[#allocation15 + $0x80]]  ;;  %v283_v16 = vshrl.u32 %v282_v14, 7 }
  0x8e   :  { %3251 = vmatprep.subr.bf16.mxu0 %v3250_v3  ;;  %v248_v9 = vld [vmem:[#allocation9] sm:$0xff]  ;;  %v280_v13 = vunpack.c.l.s4 %v3889_v12  ;;  %v4096_v45 = vld [vmem:[#allocation8] sm:$0xff]  ;;  %s2673_s26 = sld [smem:[#allocation15 + $0x1]]  ;;  %s272_s27 = sld [smem:[#allocation15]]  ;;  %v138_v1 = vld [vmem:[#allocation6 + $0x10] sm:$0xff]  ;;  %vm437_vm2 = vcmask 1041408  }
  0x8f   :  { %3253 = vmatpush3.bf16.msra.mxu0 %v3250_v3  ;;  %v4067_v11 = vpack.c.bf16 %v249_v10, %v248_v9  ;;  %v4083_v28 = vsub.s32 0, %v283_v16  ;;  %v139_v3 = vld [vmem:[#allocation6 + $0x18] sm:$0xff]  ;;  %v4129_v9 = vld [vmem:[#allocation11 + $0x8] sm:$0xff]  ;;  %vm388_vm3 = vcmask 277504   ;;  %s2714_s29 = sld [smem:[#allocation15 + $0x83]]  ;;  %s2694_s1 = sld [smem:[#allocation15 + $0x82]] }
  0x90   :  { %3255 = vmatprep.subr.bf16.mxu0 %v3254_v6  ;;  %v281_v15 = vunpack.c.0.s8 %v280_v13  ;;  %vm3891_vm4 = vmmov 0   ;;  %s2713_s28 = sld [smem:[#allocation15 + $0x3]]  ;;  %s2693_s2 = sld [smem:[#allocation15 + $0x2]]  ;;  %vm854_vm5 = vcmask 1041409   ;;  %vm856_vm6 = vcmask 1042434  }
  0x91   :  { %3291 = vmatprep.subr.bf16.mxu1 %v4067_v11  ;;  %v906_v17 = vstv %s2675_s6  ;;  %s4447_s5 = sld [smem:[#allocation15 + $0x103]]  ;;  %s4452_s9 = sld [smem:[#allocation15 + $0x102]]  ;;  %vm858_vm7 = vcmask 1043459   ;;  %vm2623_vm8 = vcmask 1043456  }
  0x92   :  { %3293 = vmatpush3.bf16.msra.mxu1 %v4067_v11  ;;  %v866_v18 = vstv %s2674_s23  ;;  %v316_v19 = vstv %s2655_s24  ;;  %v4073_v20 = vsub.s32 %v281_v15, %v283_v16  ;;  %s3893_s10 = smov [#allocation16]  }
  0x93   :  { %3257 = vmatpush3.bf16.msra.mxu0 %v3254_v6  ;;  %v276_v21 = vstv %s2654_s25  ;;  %v4119_v6 = vld [vmem:[#allocation11] sm:$0xff]  ;;  %s2633_s11 = sshll.u32 %s3893_s10, 4  ;;  %s2634_s11 = int_to_ptr.vmem [resolvable:$true] %s2633_s11 }
  0x94   :  { %2918 = vmatprep.subr.msk.mxu0 %vm158_vm1, %v144_v7  ;;  %s3845_s13 = scalar_lea.vmem %s2634_s11, 256  ;;  %p3850_p6 = scmp.lt.s32.totalorder %s2634_s11, %s2634_s11 }
  0x95   :  { %p3846_p5 = scmp.ne.s32.totalorder %s2634_s11, %s3845_s13  ;;  %p3851_p7 = scmp.lt.s32.totalorder %s3845_s13, %s3845_s13 }
  0x97   :  { %2919 = vmatpush3.msk.msra.mxu0 %vm158_vm1, %v144_v7  ;;  %v863_v7 = vstv %s2673_s26  ;;  %p3852_p8 = por %p3851_p7, %p3850_p6 }
  0x98   :  { %2921 = vmatmul.mubr.msk.f32.vlgmr.msra.gmra.mrb[0].mxu0 %vm145_vm0, %v137_v8  ;;  %3259 = vmatprep.subr.bf16.mxu0 %v4067_v11  ;;  %v273_v8 = vstv %s272_s27 }
  0x99   :  { %3261 = vmatpush3.bf16.msra.mxu0 %v4067_v11  ;;  %2923 = vmatprep.mubr.msk.f32.mxu0 %vm145_vm0, %v138_v1  ;;  %p3853_p9 = pnand %p3852_p8, %p3846_p5 }
  0x9c   :  { %2924 = vmatmul.mubr.msk.f32.gmra.mrb[2].mxu0 %vm145_vm0, %v139_v3 }
 0x16b   :  { %v4075_v22 = vpop.f32.mrb[0].mxu0 }
 0x16c   :  { %v907_v23 = vmul.f32 %v4075_v22, %v906_v17  ;;  %v4078_v24 = vpop.f32.mrb[1].mxu0  ;;  %v867_v25 = vmul.f32 %v4075_v22, %v866_v18  ;;  %v864_v10 = vmul.f32 %v4075_v22, %v863_v7 }
 0x16d   :  { %v317_v26 = vmul.f32 %v316_v19, %v4078_v24  ;;  %v277_v27 = vmul.f32 %v276_v21, %v4078_v24  ;;  %v274_v12 = vmul.f32 %v273_v8, %v4078_v24 }
 0x16e   :  { %v875_v29 = vrot.slane %v867_v25, %v4073_v20  ;;  %v915_v30 = vrot.slane %v907_v23, %v4073_v20  ;;  %v944_v13 = vrot.slane %v864_v10, 2 }
 0x16f   :  { %v285_v31 = vrot.slane %v277_v27, %v4073_v20  ;;  %v325_v32 = vrot.slane %v317_v26, %v4073_v20  ;;  %v354_v14 = vrot.slane %v274_v12, 2 }
 0x170   :  { %v883_v33 = vrot.slane %v875_v29, %v4073_v20  ;;  %v916_v34 = vcombine.high %v915_v30, %v915_v30  ;;  %v923_v35 = vrot.slane %v915_v30, %v4073_v20  ;;  %v876_v36 = vcombine.high %v875_v29, %v875_v29 }
 0x171   :  { %v293_v37 = vrot.slane %v285_v31, %v4073_v20  ;;  %v326_v38 = vcombine.high %v325_v32, %v325_v32  ;;  %v333_v39 = vrot.slane %v325_v32, %v4073_v20  ;;  %v286_v40 = vcombine.high %v285_v31, %v285_v31 }
 0x172   :  { %v891_v41 = vcombine.high %v883_v33, %v883_v33  ;;  %v930_v42 = vrot.slane %v916_v34, %v4073_v20  ;;  %v934_v43 = vrot.slane %v923_v35, %v4083_v28  ;;  %v890_v44 = vrot.slane %v876_v36, %v4073_v20 }
 0x173   :  { %v301_v46 = vcombine.high %v293_v37, %v293_v37  ;;  %v340_v47 = vrot.slane %v326_v38, %v4073_v20  ;;  %v344_v48 = vrot.slane %v333_v39, %v4083_v28  ;;  %v300_v49 = vrot.slane %v286_v40, %v4073_v20 }
 0x174   :  { %v896_v50 = vrot.slane %v891_v41, %v4083_v28  ;;  %v938_v51 = vrot.slane %v930_v42, %v4083_v28  ;;  %v892_v52 = vcombine.high %v890_v44, %v890_v44  ;;  %v941_v57 = vmul.f32 %v934_v43, %v4096_v45 }
 0x175   :  { %v306_v53 = vrot.slane %v301_v46, %v4083_v28  ;;  %v348_v54 = vrot.slane %v340_v47, %v4083_v28  ;;  %v302_v55 = vcombine.high %v300_v49, %v300_v49  ;;  %v351_v61 = vmul.f32 %v344_v48, %v4096_v45 }
 0x176   :  { %v903_v56 = vmul.f32 %v896_v50, %v4096_v45  ;;  %v942_v58 = vmul.f32 %v938_v51, %v4096_v45  ;;  %v900_v59 = vrot.slane %v892_v52, %v4083_v28  ;;  %v4167_v52 = vpop.f32.mrb[2].mxu0 }
 0x177   :  { %v313_v60 = vmul.f32 %v306_v53, %v4096_v45  ;;  %v352_v62 = vmul.f32 %v348_v54, %v4096_v45  ;;  %v310_v63 = vrot.slane %v302_v55, %v4083_v28  ;;  %v4169_v53 = vpop.f32.mrb[3].mxu0  ;;  %v257_v54 = vld [vmem:[#allocation14 + $0x8] sm:$0xff]  ;;  %v256_v55 = vld [vmem:[#allocation14] sm:$0xff] }
 0x178   :  { %946 = vxpose.xlu0.b32.start [1/5] (short) %v903_v56, 128  ;;  %v3294_v0 = vpack.c.bf16 %v942_v58, %v941_v57  ;;  %v904_v4 = vmul.f32 %v900_v59, %v4096_v45 }
 0x179   :  { %356 = vxpose.xlu1.b32.start [1/5] (short) %v313_v60, 128  ;;  %v3262_v2 = vpack.c.bf16 %v352_v62, %v351_v61  ;;  %v314_v5 = vmul.f32 %v310_v63, %v4096_v45  ;;  %v258_v63 = vld [vmem:[#allocation14 + $0x10] sm:$0xff] }
 0x17a   :  { %3295 = vmatprep.subr.bf16.mxu1 %v3294_v0 }
 0x17b   :  { %3263 = vmatprep.subr.bf16.mxu0 %v3262_v2  ;;  %3297 = vmatpush3.bf16.msra.mxu1 %v3294_v0  ;;  %v259_v0 = vld [vmem:[#allocation14 + $0x18] sm:$0xff] }
 0x17c   :  { %3015 = vmatprep.subr.msk.mxu1 %vm437_vm2, %v4075_v22  ;;  %947 = vxpose.xlu0.b32.cont [2/5] (short) %v904_v4, 128 }
 0x17d   :  { %3265 = vmatpush3.bf16.msra.mxu0 %v3262_v2  ;;  %357 = vxpose.xlu1.b32.cont [2/5] (short) %v314_v5, 128 }
 0x17e   :  { %2934 = vmatprep.subr.msk.mxu0 %vm437_vm2, %v4078_v24 }
 0x17f   :  { %3016 = vmatpush3.msk.msra.mxu1 %vm437_vm2, %v4075_v22 }
 0x180   :  { %948 = vxpose.xlu0.b32.cont [3/5] (short) %v4119_v6, 128 }
 0x181   :  { %2935 = vmatpush3.msk.msra.mxu0 %vm437_vm2, %v4078_v24  ;;  %358 = vxpose.xlu1.b32.cont [3/5] (short) %v4119_v6, 128 }
 0x184   :  { %949 = vxpose.xlu0.b32.cont [4/5] (short) %v4129_v9, 128 }
 0x185   :  { %359 = vxpose.xlu1.b32.cont [4/5] (short) %v4129_v9, 128 }
 0x188   :  { %950 = vxpose.xlu0.b32.end [5/5] (short) %v944_v13, 128  ;;  %v260_v13 = vld [vmem:[#allocation14 + $0x20] sm:$0xff] }
 0x189   :  { %360 = vxpose.xlu1.b32.end [5/5] (short) %v354_v14, 128  ;;  %v261_v14 = vld [vmem:[#allocation14 + $0x28] sm:$0xff] }
 0x1f8   :  { %v962_v15 = vpop.trf.xlu0 }
 0x1f9   :  { %3017 = vmatprep.mubr.msk.f32.mxu1 %vm388_vm3, %v962_v15  ;;  %v372_v16 = vpop.trf.xlu1 }
 0x1fa   :  { %2936 = vmatprep.mubr.msk.f32.mxu0 %vm388_vm3, %v372_v16 }
 0x1fc   :  { %v963_v17 = vpop.trf.xlu0 }
 0x1fd   :  { %3018 = vmatmul.mubr.msk.f32.vlgmr.msra.gmra.mrb[0].mxu1 %vm388_vm3, %v963_v17  ;;  %v373_v18 = vpop.trf.xlu1 }
 0x1fe   :  { %2937 = vmatmul.mubr.msk.f32.vlgmr.msra.gmra.mrb[4].mxu0 %vm388_vm3, %v373_v18 }
 0x200   :  { %v964_v19 = vpop.trf.xlu0 }
 0x201   :  { %3020 = vmatprep.mubr.msk.f32.mxu1 %vm388_vm3, %v964_v19  ;;  %v374_v21 = vpop.trf.xlu1 }
 0x202   :  { %2939 = vmatprep.mubr.msk.f32.mxu0 %vm388_vm3, %v374_v21 }
 0x204   :  { %v965_v23 = vpop.trf.xlu0 }
 0x205   :  { %3021 = vmatmul.mubr.msk.f32.gmra.mrb[2].mxu1 %vm388_vm3, %v965_v23  ;;  %v375_v25 = vpop.trf.xlu1 }
 0x206   :  { %2940 = vmatmul.mubr.msk.f32.gmra.mrb[6].mxu0 %vm388_vm3, %v375_v25 }
 0x208   :  { %v966_v26 = vpop.trf.xlu0 }
 0x209   :  { %3023 = vmatprep.mubr.msk.f32.mxu1 %vm388_vm3, %v966_v26  ;;  %v376_v27 = vpop.trf.xlu1  ;;  %v262_v26 = vld [vmem:[#allocation14 + $0x30] sm:$0xff] }
 0x20a   :  { %2942 = vmatprep.mubr.msk.f32.mxu0 %vm388_vm3, %v376_v27  ;;  %v263_v27 = vld [vmem:[#allocation14 + $0x38] sm:$0xff] }
 0x20c   :  { %v967_v29 = vpop.trf.xlu0 }
 0x20d   :  { %3024 = vmatmul.mubr.msk.f32.gmra.mrb[4].mxu1 %vm388_vm3, %v967_v29  ;;  %v377_v30 = vpop.trf.xlu1 }
 0x20e   :  { %2943 = vmatmul.mubr.msk.f32.gmra.mrb[8].mxu0 %vm388_vm3, %v377_v30 }
 0x210   :  { %v968_v31 = vpop.trf.xlu0 }
 0x211   :  { %3026 = vmatprep.mubr.msk.f32.mxu1 %vm388_vm3, %v968_v31  ;;  %v378_v32 = vpop.trf.xlu1 }
 0x212   :  { %2945 = vmatprep.mubr.msk.f32.mxu0 %vm388_vm3, %v378_v32 }
 0x214   :  { %v969_v33 = vpop.trf.xlu0 }
 0x215   :  { %3027 = vmatmul.mubr.msk.f32.gmra.mrb[6].mxu1 %vm388_vm3, %v969_v33  ;;  %v379_v34 = vpop.trf.xlu1 }
 0x216   :  { %2946 = vmatmul.mubr.msk.f32.gmra.mrb[10].mxu0 %vm388_vm3, %v379_v34 }
 0x218   :  { %v970_v35 = vpop.trf.xlu0 }
 0x219   :  { %3029 = vmatprep.mubr.msk.f32.mxu1 %vm388_vm3, %v970_v35  ;;  %v380_v36 = vpop.trf.xlu1 }
 0x21a   :  { %2948 = vmatprep.mubr.msk.f32.mxu0 %vm388_vm3, %v380_v36 }
 0x21c   :  { %v971_v37 = vpop.trf.xlu0 }
 0x21d   :  { %3030 = vmatmul.mubr.msk.f32.gmra.mrb[8].mxu1 %vm388_vm3, %v971_v37  ;;  %v381_v38 = vpop.trf.xlu1  ;;  %v264_v37 = vld [vmem:[#allocation14 + $0x40] sm:$0xff] }
 0x21e   :  { %2949 = vmatmul.mubr.msk.f32.gmra.mrb[12].mxu0 %vm388_vm3, %v381_v38  ;;  %v265_v38 = vld [vmem:[#allocation14 + $0x48] sm:$0xff] }
 0x220   :  { %v972_v39 = vpop.trf.xlu0 }
 0x221   :  { %3032 = vmatprep.mubr.msk.f32.mxu1 %vm388_vm3, %v972_v39  ;;  %v382_v40 = vpop.trf.xlu1 }
 0x222   :  { %2951 = vmatprep.mubr.msk.f32.mxu0 %vm388_vm3, %v382_v40 }
 0x224   :  { %v973_v41 = vpop.trf.xlu0 }
 0x225   :  { %3033 = vmatmul.mubr.msk.f32.gmra.mrb[10].mxu1 %vm388_vm3, %v973_v41  ;;  %v383_v42 = vpop.trf.xlu1 }
 0x226   :  { %2952 = vmatmul.mubr.msk.f32.gmra.mrb[14].mxu0 %vm388_vm3, %v383_v42 }
 0x228   :  { %v974_v43 = vpop.trf.xlu0 }
 0x229   :  { %3035 = vmatprep.mubr.msk.f32.mxu1 %vm388_vm3, %v974_v43  ;;  %v384_v44 = vpop.trf.xlu1 }
 0x22a   :  { %2954 = vmatprep.mubr.msk.f32.mxu0 %vm388_vm3, %v384_v44 }
 0x22c   :  { %v975_v46 = vpop.trf.xlu0 }
 0x22d   :  { %3036 = vmatmul.mubr.msk.f32.gmra.mrb[12].mxu1 %vm388_vm3, %v975_v46  ;;  %v385_v47 = vpop.trf.xlu1 }
 0x22e   :  { %2955 = vmatmul.mubr.msk.f32.gmra.mrb[16].mxu0 %vm388_vm3, %v385_v47 }
 0x230   :  { %v976_v48 = vpop.trf.xlu0 }
 0x231   :  { %3038 = vmatprep.mubr.msk.f32.mxu1 %vm388_vm3, %v976_v48  ;;  %v386_v49 = vpop.trf.xlu1  ;;  %v266_v48 = vld [vmem:[#allocation14 + $0x50] sm:$0xff] }
 0x232   :  { %2957 = vmatprep.mubr.msk.f32.mxu0 %vm388_vm3, %v386_v49  ;;  %v267_v49 = vld [vmem:[#allocation14 + $0x58] sm:$0xff] }
 0x234   :  { %v977_v50 = vpop.trf.xlu0 }
 0x235   :  { %3039 = vmatmul.mubr.msk.f32.gmra.mrb[14].mxu1 %vm388_vm3, %v977_v50  ;;  %v387_v51 = vpop.trf.xlu1 }
 0x236   :  { %2958 = vmatmul.mubr.msk.f32.gmra.mrb[18].mxu0 %vm388_vm3, %v387_v51 }
 0x2d0   :  { %v3019_v56 = vpop.f32.mrb[0].mxu1 }
 0x2d1   :  { %v4171_v57 = vadd.f32 %v3019_v56, %v257_v54  ;;  %v1095_v58 = vpop.f32.mrb[1].mxu1  ;;  %v2938_v59 = vpop.f32.mrb[4].mxu0 }
 0x2d2   :  { %v4173_v60 = vadd.f32 %v1095_v58, %v256_v55  ;;  %v507_v61 = vpop.f32.mrb[5].mxu0  ;;  %v4176_v62 = vadd.f32 %v2938_v59, %v257_v54 }
 0x2d3   :  { %1176 = vmax.xlane.f32.xlu1 %v4171_v57  ;;  %v4180_v2 = vadd.f32 %v507_v61, %v256_v55 }
 0x2d4   :  { %1174 = vmax.xlane.f32.xlu0 %v4173_v60 }
 0x2d7   :  { %588 = vmax.xlane.f32.xlu1 %v4176_v62 }
 0x2d8   :  { %v3022_v1 = vpop.f32.mrb[2].mxu1 }
 0x2d9   :  { %v1105_v3 = vpop.f32.mrb[3].mxu1  ;;  %v2941_v4 = vpop.f32.mrb[6].mxu0  ;;  %v4184_v8 = vadd.f32 %v3022_v1, %v259_v0 }
 0x2da   :  { %v4182_v5 = vadd.f32 %v1105_v3, %v258_v63  ;;  %v517_v7 = vpop.f32.mrb[7].mxu0  ;;  %v4190_v12 = vadd.f32 %v2941_v4, %v259_v0  ;;  %v269_v0 = vld [vmem:[#allocation14 + $0x68] sm:$0xff] }
 0x2db   :  { %586 = vmax.xlane.f32.xlu1 %v4180_v2  ;;  %v4188_v10 = vadd.f32 %v517_v7, %v258_v63  ;;  %v268_v63 = vld [vmem:[#allocation14 + $0x60] sm:$0xff] }
 0x2dc   :  { %1178 = vmax.xlane.f32.xlu0 %v4182_v5 }
 0x2df   :  { %1180 = vmax.xlane.f32.xlu1 %v4184_v8 }
 0x2e0   :  { %v3025_v15 = vpop.f32.mrb[4].mxu1  ;;  %590 = vmax.xlane.f32.xlu0 %v4188_v10 }
 0x2e1   :  { %v1115_v16 = vpop.f32.mrb[5].mxu1  ;;  %v2944_v17 = vpop.f32.mrb[8].mxu0  ;;  %v4196_v21 = vadd.f32 %v3025_v15, %v261_v14 }
 0x2e2   :  { %v4194_v18 = vadd.f32 %v1115_v16, %v260_v13  ;;  %v527_v19 = vpop.f32.mrb[9].mxu0  ;;  %v4202_v25 = vadd.f32 %v2944_v17, %v261_v14  ;;  %v270_v17 = vld [vmem:[#allocation14 + $0x70] sm:$0xff] }
 0x2e3   :  { %592 = vmax.xlane.f32.xlu1 %v4190_v12  ;;  %v4200_v23 = vadd.f32 %v527_v19, %v260_v13  ;;  %v271_v19 = vld [vmem:[#allocation14 + $0x78] sm:$0xff] }
 0x2e4   :  { %1182 = vmax.xlane.f32.xlu0 %v4194_v18 }
 0x2e7   :  { %1184 = vmax.xlane.f32.xlu1 %v4196_v21 }
 0x2e8   :  { %v3028_v29 = vpop.f32.mrb[6].mxu1  ;;  %594 = vmax.xlane.f32.xlu0 %v4200_v23 }
 0x2e9   :  { %v1125_v30 = vpop.f32.mrb[7].mxu1  ;;  %v2947_v31 = vpop.f32.mrb[10].mxu0  ;;  %v4208_v34 = vadd.f32 %v3028_v29, %v263_v27 }
 0x2ea   :  { %v4206_v32 = vadd.f32 %v1125_v30, %v262_v26  ;;  %v537_v33 = vpop.f32.mrb[11].mxu0  ;;  %v4214_v36 = vadd.f32 %v2947_v31, %v263_v27 }
 0x2eb   :  { %596 = vmax.xlane.f32.xlu1 %v4202_v25  ;;  %v4212_v35 = vadd.f32 %v537_v33, %v262_v26 }
 0x2ec   :  { %1186 = vmax.xlane.f32.xlu0 %v4206_v32 }
 0x2ef   :  { %1188 = vmax.xlane.f32.xlu1 %v4208_v34 }
 0x2f0   :  { %v3031_v39 = vpop.f32.mrb[8].mxu1  ;;  %598 = vmax.xlane.f32.xlu0 %v4212_v35 }
 0x2f1   :  { %v1135_v40 = vpop.f32.mrb[9].mxu1  ;;  %v2950_v41 = vpop.f32.mrb[12].mxu0  ;;  %v4220_v44 = vadd.f32 %v3031_v39, %v265_v38 }
 0x2f2   :  { %v4218_v42 = vadd.f32 %v1135_v40, %v264_v37  ;;  %v547_v43 = vpop.f32.mrb[13].mxu0  ;;  %v4226_v47 = vadd.f32 %v2950_v41, %v265_v38 }
 0x2f3   :  { %600 = vmax.xlane.f32.xlu1 %v4214_v36  ;;  %v4224_v46 = vadd.f32 %v547_v43, %v264_v37 }
 0x2f4   :  { %1190 = vmax.xlane.f32.xlu0 %v4218_v42 }
 0x2f7   :  { %1192 = vmax.xlane.f32.xlu1 %v4220_v44 }
 0x2f8   :  { %v3034_v50 = vpop.f32.mrb[10].mxu1  ;;  %602 = vmax.xlane.f32.xlu0 %v4224_v46 }
 0x2f9   :  { %v1145_v51 = vpop.f32.mrb[11].mxu1  ;;  %v2953_v54 = vpop.f32.mrb[14].mxu0  ;;  %v4232_v58 = vadd.f32 %v3034_v50, %v267_v49 }
 0x2fa   :  { %v4230_v55 = vadd.f32 %v1145_v51, %v266_v48  ;;  %v557_v56 = vpop.f32.mrb[15].mxu0  ;;  %v4238_v61 = vadd.f32 %v2953_v54, %v267_v49 }
 0x2fb   :  { %604 = vmax.xlane.f32.xlu1 %v4226_v47  ;;  %v4236_v59 = vadd.f32 %v557_v56, %v266_v48 }
 0x2fc   :  { %1194 = vmax.xlane.f32.xlu0 %v4230_v55 }
 0x2ff   :  { %1196 = vmax.xlane.f32.xlu1 %v4232_v58 }
 0x300   :  { %v3037_v1 = vpop.f32.mrb[12].mxu1  ;;  %606 = vmax.xlane.f32.xlu0 %v4236_v59 }
 0x301   :  { %v1155_v3 = vpop.f32.mrb[13].mxu1  ;;  %v2956_v4 = vpop.f32.mrb[16].mxu0  ;;  %v4244_v14 = vadd.f32 %v3037_v1, %v269_v0 }
 0x302   :  { %v4242_v7 = vadd.f32 %v1155_v3, %v268_v63  ;;  %v567_v13 = vpop.f32.mrb[17].mxu0  ;;  %v4250_v16 = vadd.f32 %v2956_v4, %v269_v0 }
 0x303   :  { %608 = vmax.xlane.f32.xlu1 %v4238_v61  ;;  %v4248_v15 = vadd.f32 %v567_v13, %v268_v63 }
 0x304   :  { %1198 = vmax.xlane.f32.xlu0 %v4242_v7 }
 0x307   :  { %1200 = vmax.xlane.f32.xlu1 %v4244_v14 }
 0x308   :  { %v3040_v26 = vpop.f32.mrb[14].mxu1  ;;  %610 = vmax.xlane.f32.xlu0 %v4248_v15 }
 0x309   :  { %v1165_v27 = vpop.f32.mrb[15].mxu1  ;;  %v2959_v29 = vpop.f32.mrb[18].mxu0  ;;  %v4256_v33 = vadd.f32 %v3040_v26, %v271_v19 }
 0x30a   :  { %v4254_v30 = vadd.f32 %v1165_v27, %v270_v17  ;;  %v577_v31 = vpop.f32.mrb[19].mxu0  ;;  %v4262_v38 = vadd.f32 %v2959_v29, %v271_v19 }
 0x30b   :  { %612 = vmax.xlane.f32.xlu1 %v4250_v16  ;;  %v4260_v37 = vadd.f32 %v577_v31, %v270_v17 }
 0x30c   :  { %1202 = vmax.xlane.f32.xlu0 %v4254_v30 }
 0x30f   :  { %1204 = vmax.xlane.f32.xlu1 %v4256_v33 }
 0x310   :  { %614 = vmax.xlane.f32.xlu0 %v4260_v37 }
 0x313   :  { %616 = vmax.xlane.f32.xlu1 %v4262_v38 }
 0x360   :  { %v1177_v39 = vpop.xlane.xlu1 %1176 }
 0x361   :  { %v1207_v40 = vsub.f32 %v4171_v57, %v1177_v39  ;;  %v1175_v41 = vpop.xlane.xlu0 %1174 }
 0x362   :  { %v1206_v43 = vsub.f32 %v4173_v60, %v1175_v41 }
 0x363   :  { %v1224_v48 = vmul.f32 1.442695, %v1207_v40 }
 0x364   :  { %v1222_v49 = vmul.f32 1.442695, %v1206_v43  ;;  %v589_v50 = vpop.xlane.xlu1 %588 }
 0x365   :  { %3401 = vpow2.f32 %v1224_v48  ;;  %v619_v51 = vsub.f32 %v4176_v62, %v589_v50 }
 0x366   :  { %3403 = vpow2.f32 %v1222_v49 }
 0x367   :  { %v636_v54 = vmul.f32 1.442695, %v619_v51 }
 0x368   :  { %v587_v56 = vpop.xlane.xlu1 %586 }
 0x369   :  { %3405 = vpow2.f32 %v636_v54  ;;  %v618_v63 = vsub.f32 %v4180_v2, %v587_v56  ;;  %v1179_v0 = vpop.xlane.xlu0 %1178 }
 0x36a   :  { %v1208_v1 = vsub.f32 %v4182_v5, %v1179_v0 }
 0x36b   :  { %v634_v3 = vmul.f32 1.442695, %v618_v63 }
 0x36c   :  { %v1226_v57 = vmul.f32 1.442695, %v1208_v1  ;;  %v1181_v4 = vpop.xlane.xlu1 %1180 }
 0x36d   :  { %3407 = vpow2.f32 %v634_v3  ;;  %v1209_v60 = vsub.f32 %v4184_v8, %v1181_v4  ;;  %v591_v13 = vpop.xlane.xlu0 %590 }
 0x36e   :  { %v620_v17 = vsub.f32 %v4188_v10, %v591_v13  ;;  %3409 = vpow2.f32 %v1226_v57 }
 0x36f   :  { %v4274_v19 = vpop.eup %3401  ;;  %v1228_v62 = vmul.f32 1.442695, %v1209_v60 }
 0x370   :  { %v4276_v26 = vpop.eup %3403  ;;  %v638_v27 = vmul.f32 1.442695, %v620_v17  ;;  %1256 = vadd.xlane.f32.xlu1 %v4274_v19  ;;  %v593_v2 = vpop.xlane.xlu1 %592 }
 0x371   :  { %3411 = vpow2.f32 %v1228_v62  ;;  %v621_v5 = vsub.f32 %v4190_v12, %v593_v2  ;;  %1254 = vadd.xlane.f32.xlu0 %v4276_v26  ;;  %v1183_v29 = vpop.xlane.xlu0 %1182 }
 0x372   :  { %v1210_v8 = vsub.f32 %v4194_v18, %v1183_v29  ;;  %3413 = vpow2.f32 %v638_v27 }
 0x373   :  { %v4282_v31 = vpop.eup %3405  ;;  %v640_v10 = vmul.f32 1.442695, %v621_v5 }
 0x374   :  { %v1230_v39 = vmul.f32 1.442695, %v1210_v8  ;;  %668 = vadd.xlane.f32.xlu1 %v4282_v31  ;;  %v1185_v40 = vpop.xlane.xlu1 %1184 }
 0x375   :  { %3415 = vpow2.f32 %v640_v10  ;;  %v1211_v41 = vsub.f32 %v4196_v21, %v1185_v40  ;;  %v595_v43 = vpop.xlane.xlu0 %594 }
 0x376   :  { %v622_v48 = vsub.f32 %v4200_v23, %v595_v43  ;;  %3417 = vpow2.f32 %v1230_v39 }
 0x377   :  { %v4287_v12 = vpop.eup %3407  ;;  %v1232_v49 = vmul.f32 1.442695, %v1211_v41 }
 0x378   :  { %v642_v50 = vmul.f32 1.442695, %v622_v48  ;;  %666 = vadd.xlane.f32.xlu0 %v4287_v12  ;;  %v597_v18 = vpop.xlane.xlu1 %596  ;;  %v4291_v56 = vpop.eup %3409 }
 0x379   :  { %3419 = vpow2.f32 %v1232_v49  ;;  %v623_v51 = vsub.f32 %v4202_v25, %v597_v18  ;;  %v1187_v54 = vpop.xlane.xlu0 %1186 }
 0x37a   :  { %v1212_v63 = vsub.f32 %v4206_v32, %v1187_v54  ;;  %3421 = vpow2.f32 %v642_v50 }
 0x37b   :  { %v4294_v21 = vpop.eup %3411  ;;  %v644_v0 = vmul.f32 1.442695, %v623_v51 }
 0x37c   :  { %v1234_v23 = vmul.f32 1.442695, %v1212_v63  ;;  %1258 = vadd.xlane.f32.xlu0 %v4291_v56  ;;  %1260 = vadd.xlane.f32.xlu1 %v4294_v21  ;;  %v1189_v1 = vpop.xlane.xlu1 %1188  ;;  %v4299_v25 = vpop.eup %3413 }
 0x37d   :  { %3423 = vpow2.f32 %v644_v0  ;;  %v1213_v3 = vsub.f32 %v4208_v34, %v1189_v1  ;;  %v599_v57 = vpop.xlane.xlu0 %598 }
 0x37e   :  { %v624_v4 = vsub.f32 %v4212_v35, %v599_v57  ;;  %3425 = vpow2.f32 %v1234_v23 }
 0x37f   :  { %v4302_v60 = vpop.eup %3415  ;;  %v1236_v32 = vmul.f32 1.442695, %v1213_v3 }
 0x380   :  { %v646_v13 = vmul.f32 1.442695, %v624_v4  ;;  %670 = vadd.xlane.f32.xlu0 %v4299_v25  ;;  %672 = vadd.xlane.f32.xlu1 %v4302_v60  ;;  %v601_v17 = vpop.xlane.xlu1 %600  ;;  %v4307_v34 = vpop.eup %3417 }
 0x381   :  { %3427 = vpow2.f32 %v1236_v32  ;;  %v625_v62 = vsub.f32 %v4214_v36, %v601_v17  ;;  %v1191_v27 = vpop.xlane.xlu0 %1190 }
 0x382   :  { %v1214_v2 = vsub.f32 %v4218_v42, %v1191_v27  ;;  %3429 = vpow2.f32 %v646_v13 }
 0x383   :  { %v4310_v5 = vpop.eup %3419  ;;  %v648_v35 = vmul.f32 1.442695, %v625_v62 }
 0x384   :  { %v1238_v29 = vmul.f32 1.442695, %v1214_v2  ;;  %1262 = vadd.xlane.f32.xlu0 %v4307_v34  ;;  %1264 = vadd.xlane.f32.xlu1 %v4310_v5  ;;  %v1193_v8 = vpop.xlane.xlu1 %1192  ;;  %v4315_v36 = vpop.eup %3421 }
 0x385   :  { %3431 = vpow2.f32 %v648_v35  ;;  %v1215_v10 = vsub.f32 %v4220_v44, %v1193_v8  ;;  %v603_v39 = vpop.xlane.xlu0 %602 }
 0x386   :  { %v626_v40 = vsub.f32 %v4224_v46, %v603_v39  ;;  %3433 = vpow2.f32 %v1238_v29 }
 0x387   :  { %v4318_v41 = vpop.eup %3423  ;;  %v1240_v42 = vmul.f32 1.442695, %v1215_v10 }
 0x388   :  { %v650_v43 = vmul.f32 1.442695, %v626_v40  ;;  %674 = vadd.xlane.f32.xlu0 %v4315_v36  ;;  %676 = vadd.xlane.f32.xlu1 %v4318_v41  ;;  %v605_v48 = vpop.xlane.xlu1 %604  ;;  %v4323_v44 = vpop.eup %3425 }
 0x389   :  { %3435 = vpow2.f32 %v1240_v42  ;;  %v627_v49 = vsub.f32 %v4226_v47, %v605_v48  ;;  %v1195_v50 = vpop.xlane.xlu0 %1194  ;;  %v3890_v47 = vmov 0.0|0.0  }
 0x38a   :  { %v1216_v18 = vsub.f32 %v4230_v55, %v1195_v50  ;;  %3437 = vpow2.f32 %v650_v43  ;;  %3298 = vmatprep.subr.bf16.mxu1 %v3890_v47  ;;  %3266 = vmatprep.subr.bf16.mxu0 %v3890_v47 }
 0x38b   :  { %v4326_v51 = vpop.eup %3427  ;;  %v652_v46 = vmul.f32 1.442695, %v627_v49 }
 0x38c   :  { %v1242_v54 = vmul.f32 1.442695, %v1216_v18  ;;  %1266 = vadd.xlane.f32.xlu0 %v4323_v44  ;;  %1268 = vadd.xlane.f32.xlu1 %v4326_v51  ;;  %v1197_v63 = vpop.xlane.xlu1 %1196  ;;  %v4333_v55 = vpop.eup %3429 }
 0x38d   :  { %3439 = vpow2.f32 %v652_v46  ;;  %v1217_v0 = vsub.f32 %v4232_v58, %v1197_v63  ;;  %v607_v23 = vpop.xlane.xlu0 %606 }
 0x38e   :  { %v628_v1 = vsub.f32 %v4236_v59, %v607_v23  ;;  %3441 = vpow2.f32 %v1242_v54 }
 0x38f   :  { %v4336_v3 = vpop.eup %3431  ;;  %v1244_v57 = vmul.f32 1.442695, %v1217_v0 }
 0x390   :  { %v654_v4 = vmul.f32 1.442695, %v628_v1  ;;  %678 = vadd.xlane.f32.xlu0 %v4333_v55  ;;  %680 = vadd.xlane.f32.xlu1 %v4336_v3  ;;  %v609_v58 = vpop.xlane.xlu1 %608  ;;  %v4341_v17 = vpop.eup %3433 }
 0x391   :  { %3443 = vpow2.f32 %v1244_v57  ;;  %v629_v32 = vsub.f32 %v4238_v61, %v609_v58  ;;  %v1199_v13 = vpop.xlane.xlu0 %1198 }
 0x392   :  { %v1218_v62 = vsub.f32 %v4242_v7, %v1199_v13  ;;  %3445 = vpow2.f32 %v654_v4 }
 0x393   :  { %v4344_v27 = vpop.eup %3435  ;;  %v656_v59 = vmul.f32 1.442695, %v629_v32 }
 0x394   :  { %v1246_v2 = vmul.f32 1.442695, %v1218_v62  ;;  %1270 = vadd.xlane.f32.xlu0 %v4341_v17  ;;  %1272 = vadd.xlane.f32.xlu1 %v4344_v27  ;;  %v1201_v35 = vpop.xlane.xlu1 %1200  ;;  %v4349_v61 = vpop.eup %3437 }
 0x395   :  { %3447 = vpow2.f32 %v656_v59  ;;  %v1219_v29 = vsub.f32 %v4244_v14, %v1201_v35  ;;  %v611_v8 = vpop.xlane.xlu0 %610  ;;  %v2036_v35 = vstv %s2714_s29 }
 0x396   :  { %v630_v10 = vsub.f32 %v4248_v15, %v611_v8  ;;  %3449 = vpow2.f32 %v1246_v2  ;;  %v1451_v8 = vstv %s2694_s1 }
 0x397   :  { %v4352_v39 = vpop.eup %3439  ;;  %v1248_v7 = vmul.f32 1.442695, %v1219_v29  ;;  %v2037_v29 = vmul.f32 %v4167_v52, %v2036_v35 }
 0x398   :  { %v658_v40 = vmul.f32 1.442695, %v630_v10  ;;  %682 = vadd.xlane.f32.xlu0 %v4349_v61  ;;  %684 = vadd.xlane.f32.xlu1 %v4352_v39  ;;  %v613_v42 = vpop.xlane.xlu1 %612  ;;  %v4357_v14 = vpop.eup %3441 }
 0x399   :  { %3451 = vpow2.f32 %v1248_v7  ;;  %v631_v43 = vsub.f32 %v4250_v16, %v613_v42  ;;  %v1203_v48 = vpop.xlane.xlu0 %1202  ;;  %v2045_v10 = vrot.slane %v2037_v29, %v4073_v20  ;;  %v1452_v7 = vmul.f32 %v1451_v8, %v4169_v53 }
 0x39a   :  { %v1220_v49 = vsub.f32 %v4254_v30, %v1203_v48  ;;  %3453 = vpow2.f32 %v658_v40 }
 0x39b   :  { %v4360_v50 = vpop.eup %3443  ;;  %v660_v15 = vmul.f32 1.442695, %v631_v43  ;;  %v2053_v40 = vrot.slane %v2045_v10, %v4073_v20  ;;  %v2046_v42 = vcombine.high %v2045_v10, %v2045_v10  ;;  %v3892_v43 = vmov 0.0  }
 0x39c   :  { %v1250_v18 = vmul.f32 1.442695, %v1220_v49  ;;  %1274 = vadd.xlane.f32.xlu0 %v4357_v14  ;;  %1276 = vadd.xlane.f32.xlu1 %v4360_v50  ;;  %v1205_v46 = vpop.xlane.xlu1 %1204  ;;  %v4365_v16 = vpop.eup %3445  ;;  %v1460_v48 = vrot.slane %v1452_v7, %v4073_v20  ;;  %v2033_v10 = vstv %s2713_s28 }
 0x39d   :  { %3455 = vpow2.f32 %v660_v15  ;;  %v1221_v54 = vsub.f32 %v4256_v33, %v1205_v46  ;;  %v615_v63 = vpop.xlane.xlu0 %614  ;;  %3073 = vmatprep.mubr.msk.f32.mxu1 %vm3891_vm4, %v3892_v43  ;;  %2992 = vmatprep.mubr.msk.f32.mxu0 %vm3891_vm4, %v3892_v43  ;;  %v2061_v49 = vcombine.high %v2053_v40, %v2053_v40  ;;  %v2060_v15 = vrot.slane %v2046_v42, %v4073_v20 }
 0x39e   :  { %v632_v0 = vsub.f32 %v4260_v37, %v615_v63  ;;  %3457 = vpow2.f32 %v1250_v18  ;;  %v1468_v18 = vrot.slane %v1460_v48, %v4073_v20  ;;  %v1461_v46 = vcombine.high %v1460_v48, %v1460_v48 }
 0x39f   :  { %v4368_v23 = vpop.eup %3447  ;;  %v1252_v30 = vmul.f32 1.442695, %v1221_v54  ;;  %v2066_v54 = vrot.slane %v2061_v49, %v4083_v28  ;;  %v2062_v63 = vcombine.high %v2060_v15, %v2060_v15  ;;  %v2034_v40 = vmul.f32 %v4167_v52, %v2033_v10 }
 0x3a0   :  { %v662_v1 = vmul.f32 1.442695, %v632_v0  ;;  %686 = vadd.xlane.f32.xlu0 %v4365_v16  ;;  %688 = vadd.xlane.f32.xlu1 %v4368_v23  ;;  %v617_v57 = vpop.xlane.xlu1 %616  ;;  %v4373_v58 = vpop.eup %3449  ;;  %v1476_v0 = vcombine.high %v1468_v18, %v1468_v18  ;;  %v1448_v42 = vstv %s2693_s2 }
 0x3a1   :  { %3459 = vpow2.f32 %v1252_v30  ;;  %v633_v4 = vsub.f32 %v4262_v38, %v617_v57  ;;  %v1475_v30 = vrot.slane %v1461_v46, %v4073_v20  ;;  %v2070_v57 = vrot.slane %v2062_v63, %v4083_v28 }
 0x3a2   :  { %3461 = vpow2.f32 %v662_v1  ;;  %v2073_v1 = vmul.f32 %v2066_v54, %v4096_v45  ;;  %v2114_v48 = vrot.slane %v2034_v40, 2  ;;  %v1449_v49 = vmul.f32 %v1448_v42, %v4169_v53 }
 0x3a3   :  { %v4375_v33 = vpop.eup %3451  ;;  %v664_v32 = vmul.f32 1.442695, %v633_v4  ;;  %v1481_v4 = vrot.slane %v1476_v0, %v4083_v28  ;;  %v2074_v35 = vmul.f32 %v2070_v57, %v4096_v45 }
 0x3a4   :  { %1278 = vadd.xlane.f32.xlu0 %v4373_v58  ;;  %1280 = vadd.xlane.f32.xlu1 %v4375_v33  ;;  %v4379_v37 = vpop.eup %3453  ;;  %v1529_v15 = vrot.slane %v1449_v49, 2 }
 0x3a5   :  { %3463 = vpow2.f32 %v664_v32  ;;  %v1477_v32 = vcombine.high %v1475_v30, %v1475_v30  ;;  %v1488_v29 = vmul.f32 %v1481_v4, %v4096_v45 }
 0x3a7   :  { %v4381_v13 = vpop.eup %3455  ;;  %v1485_v8 = vrot.slane %v1477_v32, %v4083_v28 }
 0x3a8   :  { %690 = vadd.xlane.f32.xlu0 %v4379_v37  ;;  %692 = vadd.xlane.f32.xlu1 %v4381_v13  ;;  %v4385_v38 = vpop.eup %3457 }
 0x3a9   :  { %v1489_v7 = vmul.f32 %v1485_v8, %v4096_v45 }
 0x3ab   :  { %v4387_v62 = vpop.eup %3459 }
 0x3ac   :  { %1282 = vadd.xlane.f32.xlu0 %v4385_v38  ;;  %1284 = vadd.xlane.f32.xlu1 %v4387_v62  ;;  %v4391_v59 = vpop.eup %3461 }
 0x3af   :  { %v4393_v2 = vpop.eup %3463 }
 0x3b0   :  { %694 = vadd.xlane.f32.xlu0 %v4391_v59  ;;  %696 = vadd.xlane.f32.xlu1 %v4393_v2 }
 0x3dd   :  { %2116 = vxpose.xlu0.b32.start [1/5] (short) %v2073_v1, 128 }
 0x3e1   :  { %2117 = vxpose.xlu0.b32.cont [2/5] (short) %v2074_v35, 128 }
 0x3e3   :  { %1531 = vxpose.xlu1.b32.start [1/5] (short) %v1488_v29, 128 }
 0x3e5   :  { %2118 = vxpose.xlu0.b32.cont [3/5] (short) %v4119_v6, 128 }
 0x3e7   :  { %1532 = vxpose.xlu1.b32.cont [2/5] (short) %v1489_v7, 128 }
 0x3e9   :  { %2119 = vxpose.xlu0.b32.cont [4/5] (short) %v4129_v9, 128 }
 0x3eb   :  { %1533 = vxpose.xlu1.b32.cont [3/5] (short) %v4119_v6, 128 }
 0x3ed   :  { %2120 = vxpose.xlu0.b32.end [5/5] (short) %v2114_v48, 128 }
 0x3ef   :  { %1534 = vxpose.xlu1.b32.cont [4/5] (short) %v4129_v9, 128 }
 0x3f3   :  { %1535 = vxpose.xlu1.b32.end [5/5] (short) %v1529_v15, 128 }
 0x3fd   :  { %v1257_v18 = vpop.xlane.xlu1 %1256 }
 0x3fe   :  { %3465 = vrcp.f32 %v1257_v18  ;;  %v1255_v46 = vpop.xlane.xlu0 %1254 }
 0x3ff   :  { %3467 = vrcp.f32 %v1255_v46 }
 0x401   :  { %v669_v45 = vpop.xlane.xlu1 %668 }
 0x402   :  { %3469 = vrcp.f32 %v669_v45 }
 0x405   :  { %v667_v54 = vpop.xlane.xlu0 %666 }
 0x406   :  { %3471 = vrcp.f32 %v667_v54 }
 0x408   :  { %v3466_v63 = vpop.eup %3465 }
 0x409   :  { %v3468_v0 = vpop.eup %3467  ;;  %v1259_v30 = vpop.xlane.xlu0 %1258  ;;  %v1303_v1 = vmul.f32 %v3466_v63, %v4274_v19 }
 0x40a   :  { %v1261_v6 = vpop.xlane.xlu1 %1260  ;;  %3473 = vrcp.f32 %v1259_v30  ;;  %v1302_v57 = vmul.f32 %v3468_v0, %v4276_v26 }
 0x40b   :  { %3475 = vrcp.f32 %v1261_v6 }
 0x40c   :  { %v3299_v9 = vpack.c.bf16 %v1303_v1, %v1302_v57  ;;  %v3470_v35 = vpop.eup %3469 }
 0x40d   :  { %v671_v4 = vpop.xlane.xlu0 %670  ;;  %v715_v19 = vmul.f32 %v3470_v35, %v4282_v31 }
 0x40e   :  { %v673_v32 = vpop.xlane.xlu1 %672  ;;  %3477 = vrcp.f32 %v671_v4  ;;  %3300 = vmatpush3.bf16.xpose.msra.mxu1 %v3299_v9 }
 0x40f   :  { %3479 = vrcp.f32 %v673_v32  ;;  %3301 = vmatprep.subr.bf16.mxu1 %v3890_v47 }
 0x410   :  { %v3472_v29 = vpop.eup %3471 }
 0x411   :  { %v1263_v8 = vpop.xlane.xlu0 %1262  ;;  %v714_v7 = vmul.f32 %v3472_v29, %v4287_v12 }
 0x412   :  { %v1265_v10 = vpop.xlane.xlu1 %1264  ;;  %3481 = vrcp.f32 %v1263_v8 }
 0x413   :  { %3483 = vrcp.f32 %v1265_v10  ;;  %v3267_v26 = vpack.c.bf16 %v715_v19, %v714_v7 }
 0x414   :  { %v3474_v40 = vpop.eup %3473 }
 0x415   :  { %v3476_v42 = vpop.eup %3475  ;;  %v675_v48 = vpop.xlane.xlu0 %674  ;;  %3268 = vmatpush3.bf16.xpose.msra.mxu0 %v3267_v26  ;;  %v1304_v15 = vmul.f32 %v3474_v40, %v4291_v56 }
 0x416   :  { %v677_v49 = vpop.xlane.xlu1 %676  ;;  %3485 = vrcp.f32 %v675_v48  ;;  %v1305_v18 = vmul.f32 %v3476_v42, %v4294_v21  ;;  %3269 = vmatprep.subr.bf16.mxu0 %v3890_v47 }
 0x417   :  { %3487 = vrcp.f32 %v677_v49 }
 0x418   :  { %v3478_v46 = vpop.eup %3477  ;;  %v3302_v12 = vpack.c.bf16 %v1305_v18, %v1304_v15 }
 0x419   :  { %v3480_v45 = vpop.eup %3479  ;;  %v1267_v31 = vpop.xlane.xlu0 %1266  ;;  %v716_v63 = vmul.f32 %v3478_v46, %v4299_v25 }
 0x41a   :  { %v1269_v54 = vpop.xlane.xlu1 %1268  ;;  %3489 = vrcp.f32 %v1267_v31  ;;  %3303 = vmatpush3.bf16.xpose.msra.mxu1 %v3302_v12  ;;  %v717_v0 = vmul.f32 %v3480_v45, %v4302_v60 }
 0x41b   :  { %3491 = vrcp.f32 %v1269_v54  ;;  %3304 = vmatprep.subr.bf16.mxu1 %v3890_v47 }
 0x41c   :  { %v3482_v56 = vpop.eup %3481  ;;  %v3270_v30 = vpack.c.bf16 %v717_v0, %v716_v63 }
 0x41d   :  { %v3484_v21 = vpop.eup %3483  ;;  %v679_v6 = vpop.xlane.xlu0 %678  ;;  %v1306_v57 = vmul.f32 %v3482_v56, %v4307_v34 }
 0x41e   :  { %v681_v1 = vpop.xlane.xlu1 %680  ;;  %3493 = vrcp.f32 %v679_v6  ;;  %3271 = vmatpush3.bf16.xpose.msra.mxu0 %v3270_v30  ;;  %v1307_v9 = vmul.f32 %v3484_v21, %v4310_v5 }
 0x41f   :  { %3495 = vrcp.f32 %v681_v1  ;;  %3272 = vmatprep.subr.bf16.mxu0 %v3890_v47 }
 0x420   :  { %v3486_v25 = vpop.eup %3485  ;;  %v3305_v4 = vpack.c.bf16 %v1307_v9, %v1306_v57 }
 0x421   :  { %v3488_v60 = vpop.eup %3487  ;;  %v1271_v32 = vpop.xlane.xlu0 %1270  ;;  %v718_v29 = vmul.f32 %v3486_v25, %v4315_v36  ;;  %v2076_v25 = vstv %s4447_s5 }
 0x422   :  { %v1273_v35 = vpop.xlane.xlu1 %1272  ;;  %3497 = vrcp.f32 %v1271_v32  ;;  %3306 = vmatpush3.bf16.xpose.msra.mxu1 %v3305_v4  ;;  %v719_v8 = vmul.f32 %v3488_v60, %v4318_v41  ;;  %v2077_v32 = vmul.f32 %v4167_v52, %v2076_v25  ;;  %v255_v25 = vld [vmem:[#allocation12 + $0x18] sm:$0xff] }
 0x423   :  { %3499 = vrcp.f32 %v1273_v35  ;;  %3307 = vmatprep.subr.bf16.mxu1 %v3890_v47 }
 0x424   :  { %v3490_v34 = vpop.eup %3489  ;;  %v3273_v10 = vpack.c.bf16 %v719_v8, %v718_v29 }
 0x425   :  { %v3492_v5 = vpop.eup %3491  ;;  %v683_v7 = vpop.xlane.xlu0 %682  ;;  %v1308_v26 = vmul.f32 %v3490_v34, %v4323_v44  ;;  %v1491_v34 = vstv %s4452_s9 }
 0x426   :  { %v685_v19 = vpop.xlane.xlu1 %684  ;;  %3501 = vrcp.f32 %v683_v7  ;;  %3274 = vmatpush3.bf16.xpose.msra.mxu0 %v3273_v10  ;;  %v1309_v40 = vmul.f32 %v3492_v5, %v4326_v51  ;;  %v1492_v7 = vmul.f32 %v1491_v34, %v4169_v53 }
 0x427   :  { %3503 = vrcp.f32 %v685_v19  ;;  %3275 = vmatprep.subr.bf16.mxu0 %v3890_v47 }
 0x428   :  { %v3494_v36 = vpop.eup %3493  ;;  %v3308_v42 = vpack.c.bf16 %v1309_v40, %v1308_v26 }
 0x429   :  { %v3496_v41 = vpop.eup %3495  ;;  %v1275_v48 = vpop.xlane.xlu0 %1274  ;;  %v720_v15 = vmul.f32 %v3494_v36, %v4333_v55  ;;  %v2085_v36 = vrot.slane %v2077_v32, %v4073_v20 }
 0x42a   :  { %v1277_v49 = vpop.xlane.xlu1 %1276  ;;  %3505 = vrcp.f32 %v1275_v48  ;;  %3309 = vmatpush3.bf16.xpose.msra.mxu1 %v3308_v42  ;;  %v721_v18 = vmul.f32 %v3496_v41, %v4336_v3 }
 0x42b   :  { %3507 = vrcp.f32 %v1277_v49  ;;  %3310 = vmatprep.subr.bf16.mxu1 %v3890_v47  ;;  %v2086_v49 = vcombine.high %v2085_v36, %v2085_v36 }
 0x42c   :  { %v3498_v44 = vpop.eup %3497  ;;  %v3276_v46 = vpack.c.bf16 %v721_v18, %v720_v15  ;;  %v1500_v15 = vrot.slane %v1492_v7, %v4073_v20 }
 0x42d   :  { %v3500_v51 = vpop.eup %3499  ;;  %v687_v12 = vpop.xlane.xlu0 %686  ;;  %v1310_v31 = vmul.f32 %v3498_v44, %v4341_v17 }
 0x42e   :  { %v689_v45 = vpop.xlane.xlu1 %688  ;;  %3509 = vrcp.f32 %v687_v12  ;;  %3277 = vmatpush3.bf16.xpose.msra.mxu0 %v3276_v46  ;;  %v1311_v55 = vmul.f32 %v3500_v51, %v4344_v27  ;;  %v2093_v51 = vrot.slane %v2085_v36, %v4073_v20  ;;  %v2100_v12 = vrot.slane %v2086_v49, %v4073_v20 }
 0x42f   :  { %3511 = vrcp.f32 %v689_v45  ;;  %3278 = vmatprep.subr.bf16.mxu0 %v3890_v47  ;;  %v1501_v45 = vcombine.high %v1500_v15, %v1500_v15 }
 0x430   :  { %v3502_v3 = vpop.eup %3501  ;;  %v3311_v54 = vpack.c.bf16 %v1311_v55, %v1310_v31 }
 0x431   :  { %v3504_v63 = vpop.eup %3503  ;;  %v1279_v0 = vpop.xlane.xlu0 %1278  ;;  %v722_v30 = vmul.f32 %v3502_v3, %v4349_v61 }
 0x432   :  { %v1281_v56 = vpop.xlane.xlu1 %1280  ;;  %3513 = vrcp.f32 %v1279_v0  ;;  %3312 = vmatpush3.bf16.xpose.msra.mxu1 %v3311_v54  ;;  %v723_v17 = vmul.f32 %v3504_v63, %v4352_v39  ;;  %v2104_v63 = vrot.slane %v2093_v51, %v4083_v28  ;;  %v1515_v0 = vrot.slane %v1501_v45, %v4073_v20 }
 0x433   :  { %3515 = vrcp.f32 %v1281_v56  ;;  %3313 = vmatprep.subr.bf16.mxu1 %v3890_v47 }
 0x434   :  { %v3506_v27 = vpop.eup %3505  ;;  %v3279_v21 = vpack.c.bf16 %v723_v17, %v722_v30  ;;  %v4486_v30 = vld [vmem:[#allocation8] sm:$0xff] }
 0x435   :  { %v3508_v6 = vpop.eup %3507  ;;  %v691_v1 = vpop.xlane.xlu0 %690  ;;  %v1312_v9 = vmul.f32 %v3506_v27, %v4357_v14  ;;  %v2111_v17 = vmul.f32 %v4486_v30, %v2104_v63 }
 0x436   :  { %v693_v57 = vpop.xlane.xlu1 %692  ;;  %3517 = vrcp.f32 %v691_v1  ;;  %3280 = vmatpush3.bf16.xpose.msra.mxu0 %v3279_v21  ;;  %v1313_v61 = vmul.f32 %v3508_v6, %v4360_v50  ;;  %v1523_v21 = vrot.slane %v1515_v0, %v4083_v28  ;;  %v252_v6 = vld [vmem:[#allocation12] sm:$0xff] }
 0x437   :  { %3519 = vrcp.f32 %v693_v57  ;;  %3281 = vmatprep.subr.bf16.mxu0 %v3890_v47  ;;  %v253_v57 = vld [vmem:[#allocation12 + $0x8] sm:$0xff] }
 0x438   :  { %v3510_v39 = vpop.eup %3509  ;;  %v3314_v4 = vpack.c.bf16 %v1313_v61, %v1312_v9  ;;  %v1527_v1 = vmul.f32 %v4486_v30, %v1523_v21  ;;  %v254_v9 = vld [vmem:[#allocation12 + $0x10] sm:$0xff]  ;;  %v1318_v61 = vrot.slane %v4075_v22, 4 }
 0x439   :  { %v3512_v60 = vpop.eup %3511  ;;  %v1283_v35 = vpop.xlane.xlu0 %1282  ;;  %v724_v8 = vmul.f32 %v3510_v39, %v4365_v16 }
 0x43a   :  { %v1285_v29 = vpop.xlane.xlu1 %1284  ;;  %3521 = vrcp.f32 %v1283_v35  ;;  %3315 = vmatpush3.bf16.xpose.msra.mxu1 %v3314_v4  ;;  %v725_v14 = vmul.f32 %v3512_v60, %v4368_v23  ;;  %v730_v60 = vrot.slane %v4078_v24, 4 }
 0x43b   :  { %3523 = vrcp.f32 %v1285_v29  ;;  %3316 = vmatprep.subr.bf16.mxu1 %v3890_v47 }
 0x43c   :  { %v3514_v50 = vpop.eup %3513  ;;  %v3282_v10 = vpack.c.bf16 %v725_v14, %v724_v8 }
 0x43d   :  { %v3516_v5 = vpop.eup %3515  ;;  %v695_v19 = vpop.xlane.xlu0 %694  ;;  %v1314_v40 = vmul.f32 %v3514_v50, %v4373_v58 }
 0x43e   :  { %v697_v26 = vpop.xlane.xlu1 %696  ;;  %3525 = vrcp.f32 %v695_v19  ;;  %3283 = vmatpush3.bf16.xpose.msra.mxu0 %v3282_v10  ;;  %v1315_v16 = vmul.f32 %v3516_v5, %v4375_v33 }
 0x43f   :  { %3527 = vrcp.f32 %v697_v26  ;;  %3284 = vmatprep.subr.bf16.mxu0 %v3890_v47 }
 0x440   :  { %v3518_v23 = vpop.eup %3517  ;;  %v3317_v42 = vpack.c.bf16 %v1315_v16, %v1314_v40 }
 0x441   :  { %v3520_v41 = vpop.eup %3519  ;;  %v726_v48 = vmul.f32 %v3518_v23, %v4379_v37 }
 0x442   :  { %3318 = vmatpush3.bf16.xpose.msra.mxu1 %v3317_v42  ;;  %v727_v58 = vmul.f32 %v3520_v41, %v4381_v13  ;;  %v1508_v13 = vrot.slane %v1500_v15, %v4073_v20 }
 0x443   :  { %3319 = vmatprep.subr.bf16.mxu1 %v3890_v47 }
 0x444   :  { %v3522_v18 = vpop.eup %3521  ;;  %v3285_v44 = vpack.c.bf16 %v727_v58, %v726_v48 }
 0x445   :  { %v3524_v46 = vpop.eup %3523  ;;  %v1316_v33 = vmul.f32 %v3522_v18, %v4385_v38  ;;  %v2108_v38 = vrot.slane %v2100_v12, %v4083_v28 }
 0x446   :  { %3286 = vmatpush3.bf16.xpose.msra.mxu0 %v3285_v44  ;;  %v1317_v37 = vmul.f32 %v3524_v46, %v4387_v62 }
 0x447   :  { %3287 = vmatprep.subr.bf16.mxu0 %v3890_v47  ;;  %v2112_v27 = vmul.f32 %v4486_v30, %v2108_v38 }
 0x448   :  { %v3526_v31 = vpop.eup %3525  ;;  %v3320_v55 = vpack.c.bf16 %v1317_v37, %v1316_v33 }
 0x449   :  { %v3528_v3 = vpop.eup %3527  ;;  %v728_v54 = vmul.f32 %v3526_v31, %v4391_v59  ;;  %v1519_v59 = vrot.slane %v1508_v13, %v4083_v28  ;;  %v3358_v20 = vpack.c.bf16 %v2112_v27, %v2111_v17 }
 0x44a   :  { %3321 = vmatpush3.bf16.xpose.msra.mxu1 %v3320_v55  ;;  %v729_v56 = vmul.f32 %v3528_v3, %v4393_v2 }
 0x44b   :  { %3355 = vmatprep.subr.bf16.mxu1 %v4067_v11  ;;  %v1526_v2 = vmul.f32 %v4486_v30, %v1519_v59 }
 0x44c   :  { %v3288_v62 = vpack.c.bf16 %v729_v56, %v728_v54 }
 0x44d   :  { %v3326_v28 = vpack.c.bf16 %v1527_v1, %v1526_v2 }
 0x44e   :  { %3289 = vmatpush3.bf16.xpose.msra.mxu0 %v3288_v62 }
 0x44f   :  { %3323 = vmatprep.subr.bf16.mxu0 %v4067_v11 }
 0x451   :  { %3074 = vmatmul.mubr.f32.vlgmr.msra.gmra.mrb[16].mxu1 %v252_v6 }
 0x452   :  { %3357 = vmatpush3.bf16.msra.mxu1 %v4067_v11  ;;  %3076 = vmatprep.mubr.msk.f32.mxu1 %vm3891_vm4, %v3892_v43 }
 0x453   :  { %3359 = vmatprep.subr.bf16.mxu1 %v3358_v20 }
 0x455   :  { %2993 = vmatmul.mubr.f32.vlgmr.msra.gmra.mrb[20].mxu0 %v252_v6  ;;  %3077 = vmatmul.mubr.f32.gmra.mrb[18].mxu1 %v253_v57 }
 0x456   :  { %3325 = vmatpush3.bf16.msra.mxu0 %v4067_v11  ;;  %3361 = vmatpush3.bf16.msra.mxu1 %v3358_v20 }
 0x457   :  { %3327 = vmatprep.subr.bf16.mxu0 %v3326_v28  ;;  %3177 = vmatprep.subr.msk.mxu1 %vm437_vm2, %v4167_v52 }
 0x458   :  { %2995 = vmatprep.mubr.msk.f32.mxu0 %vm3891_vm4, %v3892_v43  ;;  %3079 = vmatprep.mubr.msk.f32.mxu1 %vm3891_vm4, %v3892_v43 }
 0x459   :  { %2996 = vmatmul.mubr.f32.gmra.mrb[22].mxu0 %v253_v57  ;;  %3080 = vmatmul.mubr.f32.gmra.mrb[20].mxu1 %v254_v9 }
 0x45a   :  { %3329 = vmatpush3.bf16.msra.mxu0 %v3326_v28  ;;  %3178 = vmatpush3.msk.msra.mxu1 %vm437_vm2, %v4167_v52 }
 0x45b   :  { %3096 = vmatprep.subr.msk.mxu0 %vm437_vm2, %v4169_v53  ;;  %2998 = vmatprep.mubr.msk.f32.mxu0 %vm3891_vm4, %v3892_v43 }
 0x45c   :  { %3082 = vmatprep.mubr.msk.f32.mxu1 %vm3891_vm4, %v3892_v43  ;;  %3362 = vmatprep.subr.bf16.mxu1 %v3890_v47 }
 0x45d   :  { %2999 = vmatmul.mubr.f32.gmra.mrb[24].mxu0 %v254_v9  ;;  %3083 = vmatmul.mubr.f32.gmra.mrb[22].mxu1 %v255_v25  ;;  %v2132_v11 = vpop.trf.xlu0 }
 0x45e   :  { %3097 = vmatpush3.msk.msra.mxu0 %vm437_vm2, %v4169_v53  ;;  %3001 = vmatprep.mubr.msk.f32.mxu0 %vm3891_vm4, %v3892_v43 }
 0x45f   :  { %3085 = vmatprep.mubr.msk.f32.mxu1 %vm3891_vm4, %v3892_v43  ;;  %3330 = vmatprep.subr.bf16.mxu0 %v3890_v47 }
 0x461   :  { %3002 = vmatmul.mubr.f32.gmra.mrb[26].mxu0 %v255_v25  ;;  %3086 = vmatmul.mubr.f32.gmra.mrb[24].mxu1 %v1318_v61  ;;  %v2133_v39 = vpop.trf.xlu0 }
 0x462   :  { %3179 = vmatprep.mubr.msk.f32.mxu1 %vm388_vm3, %v2132_v11  ;;  %3004 = vmatprep.mubr.msk.f32.mxu0 %vm3891_vm4, %v3892_v43 }
 0x463   :  { %v1547_v4 = vpop.trf.xlu1 }
 0x465   :  { %3005 = vmatmul.mubr.f32.gmra.mrb[28].mxu0 %v730_v60  ;;  %3180 = vmatmul.mubr.msk.f32.vlgmr.msra.gmra.mrb[26].mxu1 %vm388_vm3, %v2133_v39  ;;  %v2134_v32 = vpop.trf.xlu0 }
 0x466   :  { %3098 = vmatprep.mubr.msk.f32.mxu0 %vm388_vm3, %v1547_v4  ;;  %3182 = vmatprep.mubr.msk.f32.mxu1 %vm388_vm3, %v2134_v32 }
 0x467   :  { %v1548_v22 = vpop.trf.xlu1 }
 0x469   :  { %3099 = vmatmul.mubr.msk.f32.vlgmr.msra.gmra.mrb[30].mxu0 %vm388_vm3, %v1548_v22  ;;  %v2135_v35 = vpop.trf.xlu0 }
 0x46a   :  { %3183 = vmatmul.mubr.msk.f32.gmra.mrb[28].mxu1 %vm388_vm3, %v2135_v35 }
 0x46b   :  { %v1549_v29 = vpop.trf.xlu1 }
 0x46c   :  { %3101 = vmatprep.mubr.msk.f32.mxu0 %vm388_vm3, %v1549_v29 }
 0x46d   :  { %v2136_v8 = vpop.trf.xlu0 }
 0x46e   :  { %3185 = vmatprep.mubr.msk.f32.mxu1 %vm388_vm3, %v2136_v8 }
 0x46f   :  { %v1550_v24 = vpop.trf.xlu1 }
 0x470   :  { %3102 = vmatmul.mubr.msk.f32.gmra.mrb[32].mxu0 %vm388_vm3, %v1550_v24 }
 0x471   :  { %v2137_v34 = vpop.trf.xlu0 }
 0x472   :  { %3186 = vmatmul.mubr.msk.f32.gmra.mrb[30].mxu1 %vm388_vm3, %v2137_v34 }
 0x473   :  { %v1551_v14 = vpop.trf.xlu1 }
 0x474   :  { %3104 = vmatprep.mubr.msk.f32.mxu0 %vm388_vm3, %v1551_v14 }
 0x475   :  { %v2138_v50 = vpop.trf.xlu0 }
 0x476   :  { %3188 = vmatprep.mubr.msk.f32.mxu1 %vm388_vm3, %v2138_v50 }
 0x477   :  { %v1552_v10 = vpop.trf.xlu1 }
 0x478   :  { %3105 = vmatmul.mubr.msk.f32.gmra.mrb[34].mxu0 %vm388_vm3, %v1552_v10 }
 0x479   :  { %v2139_v5 = vpop.trf.xlu0 }
 0x47a   :  { %3189 = vmatmul.mubr.msk.f32.gmra.mrb[32].mxu1 %vm388_vm3, %v2139_v5 }
 0x47b   :  { %v1553_v7 = vpop.trf.xlu1 }
 0x47c   :  { %3107 = vmatprep.mubr.msk.f32.mxu0 %vm388_vm3, %v1553_v7 }
 0x47d   :  { %v2140_v19 = vpop.trf.xlu0 }
 0x47e   :  { %3191 = vmatprep.mubr.msk.f32.mxu1 %vm388_vm3, %v2140_v19 }
 0x47f   :  { %v1554_v26 = vpop.trf.xlu1 }
 0x480   :  { %3108 = vmatmul.mubr.msk.f32.gmra.mrb[36].mxu0 %vm388_vm3, %v1554_v26 }
 0x481   :  { %v2141_v40 = vpop.trf.xlu0 }
 0x482   :  { %3192 = vmatmul.mubr.msk.f32.gmra.mrb[34].mxu1 %vm388_vm3, %v2141_v40 }
 0x483   :  { %v1555_v36 = vpop.trf.xlu1 }
 0x484   :  { %3110 = vmatprep.mubr.msk.f32.mxu0 %vm388_vm3, %v1555_v36 }
 0x485   :  { %v2142_v16 = vpop.trf.xlu0 }
 0x486   :  { %3194 = vmatprep.mubr.msk.f32.mxu1 %vm388_vm3, %v2142_v16 }
 0x487   :  { %v1556_v23 = vpop.trf.xlu1 }
 0x488   :  { %3111 = vmatmul.mubr.msk.f32.gmra.mrb[38].mxu0 %vm388_vm3, %v1556_v23 }
 0x489   :  { %v2143_v42 = vpop.trf.xlu0 }
 0x48a   :  { %3195 = vmatmul.mubr.msk.f32.gmra.mrb[36].mxu1 %vm388_vm3, %v2143_v42 }
 0x48b   :  { %v1557_v41 = vpop.trf.xlu1 }
 0x48c   :  { %3113 = vmatprep.mubr.msk.f32.mxu0 %vm388_vm3, %v1557_v41 }
 0x48d   :  { %v2144_v48 = vpop.trf.xlu0 }
 0x48e   :  { %3197 = vmatprep.mubr.msk.f32.mxu1 %vm388_vm3, %v2144_v48 }
 0x48f   :  { %v1558_v49 = vpop.trf.xlu1 }
 0x490   :  { %3114 = vmatmul.mubr.msk.f32.gmra.mrb[40].mxu0 %vm388_vm3, %v1558_v49 }
 0x491   :  { %v2145_v15 = vpop.trf.xlu0 }
 0x492   :  { %3198 = vmatmul.mubr.msk.f32.gmra.mrb[38].mxu1 %vm388_vm3, %v2145_v15 }
 0x493   :  { %v1559_v58 = vpop.trf.xlu1 }
 0x494   :  { %3116 = vmatprep.mubr.msk.f32.mxu0 %vm388_vm3, %v1559_v58 }
 0x495   :  { %v2146_v18 = vpop.trf.xlu0 }
 0x496   :  { %3200 = vmatprep.mubr.msk.f32.mxu1 %vm388_vm3, %v2146_v18 }
 0x497   :  { %v1560_v44 = vpop.trf.xlu1 }
 0x498   :  { %3117 = vmatmul.mubr.msk.f32.gmra.mrb[42].mxu0 %vm388_vm3, %v1560_v44 }
 0x499   :  { %v2147_v46 = vpop.trf.xlu0 }
 0x49a   :  { %3201 = vmatmul.mubr.msk.f32.gmra.mrb[40].mxu1 %vm388_vm3, %v2147_v46 }
 0x49b   :  { %v1561_v33 = vpop.trf.xlu1  ;;  %3235 = vmatprep.mubr.msk.f32.mxu1 %vm3891_vm4, %v3892_v43 }
 0x49c   :  { %3119 = vmatprep.mubr.msk.f32.mxu0 %vm388_vm3, %v1561_v33 }
 0x49f   :  { %v1562_v51 = vpop.trf.xlu1 }
 0x4a0   :  { %3120 = vmatmul.mubr.msk.f32.gmra.mrb[44].mxu0 %vm388_vm3, %v1562_v51 }
 0x4a1   :  { %3154 = vmatprep.mubr.msk.f32.mxu0 %vm3891_vm4, %v3892_v43 }
 0x524   :  { %v1386_v12 = vpop.f32.mrb[16].mxu1 }
 0x525   :  { %v1410_v45 = vmul.f32 %v4486_v30, %v1386_v12  ;;  %v3075_v37 = vpop.f32.mrb[17].mxu1 }
 0x527   :  { %v1414_v31 = vrot.slane %v1410_v45, 4 }
 0x528   :  { %v798_v55 = vpop.f32.mrb[20].mxu0  ;;  %v1391_v13 = vpop.f32.mrb[18].mxu1 }
 0x529   :  { %v1415_v3 = vadd.f32 %v1414_v31, %v1410_v45  ;;  %v822_v54 = vmul.f32 %v4486_v30, %v798_v55  ;;  %v1411_v63 = vmul.f32 %v4486_v30, %v1391_v13  ;;  %v2994_v38 = vpop.f32.mrb[21].mxu0  ;;  %v3078_v0 = vpop.f32.mrb[19].mxu1 }
 0x52b   :  { %v1416_v56 = vrot.slane %v1415_v3, 2  ;;  %v826_v62 = vrot.slane %v822_v54, 4  ;;  %v1420_v17 = vrot.slane %v1411_v63, 4 }
 0x52c   :  { %v803_v27 = vpop.f32.mrb[22].mxu0  ;;  %v1396_v59 = vpop.f32.mrb[20].mxu1 }
 0x52d   :  { %v1417_v21 = vadd.f32 %v1416_v56, %v1415_v3  ;;  %v827_v6 = vadd.f32 %v826_v62, %v822_v54  ;;  %v1421_v20 = vadd.f32 %v1420_v17, %v1411_v63  ;;  %v823_v2 = vmul.f32 %v4486_v30, %v803_v27  ;;  %v2997_v1 = vpop.f32.mrb[23].mxu0  ;;  %v3081_v57 = vpop.f32.mrb[21].mxu1  ;;  %v3658_v54 = vld [vmem:[#allocation14 + $0x8] sm:$0xff]  ;;  %v3659_v17 = vld [vmem:[#allocation14] sm:$0xff] }
 0x52e   :  { %v1412_v28 = vmul.f32 %v4486_v30, %v1396_v59 }
 0x52f   :  { %v828_v9 = vrot.slane %v827_v6, 2  ;;  %v1422_v25 = vrot.slane %v1421_v20, 2  ;;  %v832_v11 = vrot.slane %v823_v2, 4  ;;  %v1418_v61 = vrot.slane %v1417_v21, 1 }
 0x530   :  { %v1426_v39 = vrot.slane %v1412_v28, 4  ;;  %v808_v4 = vpop.f32.mrb[24].mxu0  ;;  %v1401_v60 = vpop.f32.mrb[22].mxu1 }
 0x531   :  { %v829_v32 = vadd.f32 %v828_v9, %v827_v6  ;;  %v1423_v22 = vadd.f32 %v1422_v25, %v1421_v20  ;;  %v833_v35 = vadd.f32 %v832_v11, %v823_v2  ;;  %v3000_v29 = vpop.f32.mrb[25].mxu0  ;;  %v3084_v8 = vpop.f32.mrb[23].mxu1  ;;  %v824_v34 = vmul.f32 %v4486_v30, %v808_v4 }
 0x532   :  { %v1427_v24 = vadd.f32 %v1426_v39, %v1412_v28  ;;  %v1413_v14 = vmul.f32 %v4486_v30, %v1401_v60  ;;  %v1419_v5 = vadd.f32 %v1418_v61, %v1417_v21  ;;  %v3661_v8 = vld [vmem:[#allocation14 + $0x10] sm:$0xff] }
 0x533   :  { %v1424_v50 = vrot.slane %v1423_v22, 1  ;;  %v834_v10 = vrot.slane %v833_v35, 2  ;;  %v838_v19 = vrot.slane %v824_v34, 4  ;;  %v830_v16 = vrot.slane %v829_v32, 1 }
 0x534   :  { %v1428_v7 = vrot.slane %v1427_v24, 2  ;;  %v1432_v26 = vrot.slane %v1413_v14, 4  ;;  %v813_v40 = vpop.f32.mrb[26].mxu0  ;;  %v1406_v36 = vpop.f32.mrb[24].mxu1 }
 0x535   :  { %v1425_v23 = vadd.f32 %v1424_v50, %v1423_v22  ;;  %v835_v42 = vadd.f32 %v834_v10, %v833_v35  ;;  %v825_v41 = vmul.f32 %v4486_v30, %v813_v40  ;;  %v3003_v48 = vpop.f32.mrb[27].mxu0  ;;  %v3087_v49 = vpop.f32.mrb[25].mxu1  ;;  %v839_v58 = vadd.f32 %v838_v19, %v824_v34 }
 0x536   :  { %v1429_v15 = vadd.f32 %v1428_v7, %v1427_v24  ;;  %v1433_v18 = vadd.f32 %v1432_v26, %v1413_v14  ;;  %v831_v55 = vadd.f32 %v830_v16, %v829_v32  ;;  %v3660_v32 = vld [vmem:[#allocation14 + $0x18] sm:$0xff]  ;;  %v3663_v48 = vld [vmem:[#allocation14 + $0x20] sm:$0xff] }
 0x537   :  { %v836_v44 = vrot.slane %v835_v42, 1  ;;  %v844_v46 = vrot.slane %v825_v41, 4  ;;  %v1442_v33 = vsel %vm854_vm5, %v1425_v23, %v1419_v5  ;;  %v840_v12 = vrot.slane %v839_v58, 2 }
 0x538   :  { %v1430_v51 = vrot.slane %v1429_v15, 1  ;;  %v1434_v45 = vrot.slane %v1433_v18, 2  ;;  %v818_v37 = vpop.f32.mrb[28].mxu0  ;;  %v3181_v31 = vpop.f32.mrb[26].mxu1 }
 0x539   :  { %v837_v13 = vadd.f32 %v836_v44, %v835_v42  ;;  %v845_v3 = vadd.f32 %v844_v46, %v825_v41  ;;  %v4570_v30 = vadd.f32 %v3658_v54, %v3181_v31  ;;  %v3006_v63 = vpop.f32.mrb[29].mxu0  ;;  %v2265_v38 = vpop.f32.mrb[27].mxu1  ;;  %v841_v56 = vadd.f32 %v840_v12, %v839_v58  ;;  %v3662_v42 = vld [vmem:[#allocation14 + $0x28] sm:$0xff] }
 0x53a   :  { %v1431_v0 = vadd.f32 %v1430_v51, %v1429_v15  ;;  %v1435_v62 = vadd.f32 %v1434_v45, %v1433_v18  ;;  %v4572_v27 = vadd.f32 %v3659_v17, %v2265_v38  ;;  %v3664_v51 = vld [vmem:[#allocation14 + $0x38] sm:$0xff]  ;;  %v3665_v45 = vld [vmem:[#allocation14 + $0x30] sm:$0xff]  ;;  %v3666_v38 = vld [vmem:[#allocation14 + $0x48] sm:$0xff] }
 0x53b   :  { %v846_v59 = vrot.slane %v845_v3, 2  ;;  %v855_v21 = vsel %vm854_vm5, %v837_v13, %v831_v55  ;;  %2346 = vmax.xlane.f32.xlu1 %v4570_v30  ;;  %v842_v6 = vrot.slane %v841_v56, 1 }
 0x53c   :  { %v1436_v20 = vrot.slane %v1435_v62, 1  ;;  %v1443_v2 = vsel %vm856_vm6, %v1431_v0, %v1442_v33  ;;  %2344 = vmax.xlane.f32.xlu0 %v4572_v27  ;;  %v3100_v1 = vpop.f32.mrb[30].mxu0 }
 0x53d   :  { %v847_v57 = vadd.f32 %v846_v59, %v845_v3  ;;  %v4578_v28 = vadd.f32 %v3658_v54, %v3100_v1  ;;  %v1680_v9 = vpop.f32.mrb[31].mxu0  ;;  %v3184_v25 = vpop.f32.mrb[28].mxu1  ;;  %v843_v11 = vadd.f32 %v842_v6, %v841_v56  ;;  %v3667_v56 = vld [vmem:[#allocation14 + $0x40] sm:$0xff]  ;;  %v3668_v1 = vld [vmem:[#allocation14 + $0x58] sm:$0xff] }
 0x53e   :  { %v1437_v61 = vadd.f32 %v1436_v20, %v1435_v62  ;;  %v4580_v39 = vadd.f32 %v3659_v17, %v1680_v9  ;;  %v2275_v4 = vpop.f32.mrb[29].mxu1  ;;  %v4583_v22 = vadd.f32 %v3660_v32, %v3184_v25  ;;  %v3669_v9 = vld [vmem:[#allocation14 + $0x50] sm:$0xff] }
 0x53f   :  { %v848_v60 = vrot.slane %v847_v57, 1  ;;  %1761 = vmax.xlane.f32.xlu1 %v4578_v28  ;;  %v857_v29 = vsel %vm856_vm6, %v843_v11, %v855_v21  ;;  %v4588_v24 = vadd.f32 %v3661_v8, %v2275_v4 }
 0x540   :  { %v1444_v35 = vsel %vm858_vm7, %v1437_v61, %v1443_v2  ;;  %1759 = vmax.xlane.f32.xlu0 %v4580_v39 }
 0x541   :  { %v1446_v34 = vadd.f32 %v1444_v35, %v1406_v36  ;;  %v849_v14 = vadd.f32 %v848_v60, %v847_v57 }
 0x543   :  { %v859_v50 = vsel %vm858_vm7, %v849_v14, %v857_v29  ;;  %2350 = vmax.xlane.f32.xlu1 %v4583_v22  ;;  %v3103_v10 = vpop.f32.mrb[32].mxu0  ;;  %v2618_v5 = vrot.slane %v1446_v34, 4  ;;  %v3670_v29 = vld [vmem:[#allocation14 + $0x68] sm:$0xff]  ;;  %v3671_v34 = vld [vmem:[#allocation14 + $0x60] sm:$0xff] }
 0x544   :  { %v861_v7 = vadd.f32 %v859_v50, %v818_v37  ;;  %2348 = vmax.xlane.f32.xlu0 %v4588_v24  ;;  %v4593_v19 = vadd.f32 %v3660_v32, %v3103_v10  ;;  %v1690_v26 = vpop.f32.mrb[33].mxu0 }
 0x545   :  { %v4595_v40 = vadd.f32 %v3661_v8, %v1690_v26  ;;  %v3187_v16 = vpop.f32.mrb[30].mxu1 }
 0x546   :  { %v2285_v23 = vpop.f32.mrb[31].mxu1  ;;  %v2624_v36 = vsel %vm2623_vm8, %v861_v7, %v2618_v5  ;;  %v4599_v41 = vadd.f32 %v3662_v42, %v3187_v16 }
 0x547   :  { %1765 = vmax.xlane.f32.xlu1 %v4593_v19  ;;  %2626 = vst [vmem:[#allocation16] sm:$0xff] %v2624_v36  ;;  %v4602_v49 = vadd.f32 %v3663_v48, %v2285_v23  ;;  %v3672_v23 = vld [vmem:[#allocation14 + $0x78] sm:$0xff] }
 0x548   :  { %1763 = vmax.xlane.f32.xlu0 %v4595_v40 }
 0x54b   :  { %2354 = vmax.xlane.f32.xlu1 %v4599_v41  ;;  %v3106_v15 = vpop.f32.mrb[34].mxu0 }
 0x54c   :  { %2352 = vmax.xlane.f32.xlu0 %v4602_v49  ;;  %v4606_v58 = vadd.f32 %v3662_v42, %v3106_v15  ;;  %v1700_v18 = vpop.f32.mrb[35].mxu0  ;;  %v3673_v42 = vld [vmem:[#allocation14 + $0x70] sm:$0xff] }
 0x54d   :  { %v4608_v44 = vadd.f32 %v3663_v48, %v1700_v18  ;;  %v3190_v46 = vpop.f32.mrb[32].mxu1 }
 0x54e   :  { %v2295_v33 = vpop.f32.mrb[33].mxu1  ;;  %v4611_v12 = vadd.f32 %v3664_v51, %v3190_v46 }
 0x54f   :  { %1769 = vmax.xlane.f32.xlu1 %v4606_v58  ;;  %v4614_v37 = vadd.f32 %v3665_v45, %v2295_v33 }
 0x550   :  { %1767 = vmax.xlane.f32.xlu0 %v4608_v44 }
 0x553   :  { %2358 = vmax.xlane.f32.xlu1 %v4611_v12  ;;  %v3109_v31 = vpop.f32.mrb[36].mxu0 }
 0x554   :  { %2356 = vmax.xlane.f32.xlu0 %v4614_v37  ;;  %v4618_v55 = vadd.f32 %v3664_v51, %v3109_v31  ;;  %v1710_v13 = vpop.f32.mrb[37].mxu0 }
 0x555   :  { %v4620_v3 = vadd.f32 %v3665_v45, %v1710_v13  ;;  %v3193_v54 = vpop.f32.mrb[34].mxu1 }
 0x556   :  { %v2305_v63 = vpop.f32.mrb[35].mxu1  ;;  %v4623_v0 = vadd.f32 %v3666_v38, %v3193_v54 }
 0x557   :  { %1773 = vmax.xlane.f32.xlu1 %v4618_v55  ;;  %v4626_v62 = vadd.f32 %v3667_v56, %v2305_v63 }
 0x558   :  { %1771 = vmax.xlane.f32.xlu0 %v4620_v3 }
 0x55b   :  { %2362 = vmax.xlane.f32.xlu1 %v4623_v0  ;;  %v3112_v17 = vpop.f32.mrb[38].mxu0 }
 0x55c   :  { %2360 = vmax.xlane.f32.xlu0 %v4626_v62  ;;  %v4630_v59 = vadd.f32 %v3666_v38, %v3112_v17  ;;  %v1720_v21 = vpop.f32.mrb[39].mxu0 }
 0x55d   :  { %v4632_v6 = vadd.f32 %v3667_v56, %v1720_v21  ;;  %v3196_v20 = vpop.f32.mrb[36].mxu1 }
 0x55e   :  { %v2315_v2 = vpop.f32.mrb[37].mxu1  ;;  %v4635_v57 = vadd.f32 %v3668_v1, %v3196_v20 }
 0x55f   :  { %1777 = vmax.xlane.f32.xlu1 %v4630_v59  ;;  %v4638_v25 = vadd.f32 %v3669_v9, %v2315_v2 }
 0x560   :  { %1775 = vmax.xlane.f32.xlu0 %v4632_v6 }
 0x563   :  { %2366 = vmax.xlane.f32.xlu1 %v4635_v57  ;;  %v3115_v11 = vpop.f32.mrb[40].mxu0 }
 0x564   :  { %2364 = vmax.xlane.f32.xlu0 %v4638_v25  ;;  %v4642_v61 = vadd.f32 %v3668_v1, %v3115_v11  ;;  %v1730_v4 = vpop.f32.mrb[41].mxu0 }
 0x565   :  { %v4644_v60 = vadd.f32 %v3669_v9, %v1730_v4  ;;  %v3199_v32 = vpop.f32.mrb[38].mxu1 }
 0x566   :  { %v2325_v35 = vpop.f32.mrb[39].mxu1  ;;  %v4647_v8 = vadd.f32 %v3670_v29, %v3199_v32 }
 0x567   :  { %1781 = vmax.xlane.f32.xlu1 %v4642_v61  ;;  %v4650_v14 = vadd.f32 %v3671_v34, %v2325_v35 }
 0x568   :  { %1779 = vmax.xlane.f32.xlu0 %v4644_v60 }
 0x56b   :  { %2370 = vmax.xlane.f32.xlu1 %v4647_v8  ;;  %v3118_v50 = vpop.f32.mrb[42].mxu0 }
 0x56c   :  { %2368 = vmax.xlane.f32.xlu0 %v4650_v14  ;;  %v4654_v10 = vadd.f32 %v3670_v29, %v3118_v50  ;;  %v1740_v5 = vpop.f32.mrb[43].mxu0 }
 0x56d   :  { %v4656_v7 = vadd.f32 %v3671_v34, %v1740_v5  ;;  %v3202_v26 = vpop.f32.mrb[40].mxu1 }
 0x56e   :  { %v2335_v16 = vpop.f32.mrb[41].mxu1  ;;  %v4659_v36 = vadd.f32 %v3672_v23, %v3202_v26 }
 0x56f   :  { %1785 = vmax.xlane.f32.xlu1 %v4654_v10  ;;  %v4662_v48 = vadd.f32 %v3673_v42, %v2335_v16 }
 0x570   :  { %1783 = vmax.xlane.f32.xlu0 %v4656_v7 }
 0x573   :  { %2374 = vmax.xlane.f32.xlu1 %v4659_v36  ;;  %v3121_v15 = vpop.f32.mrb[44].mxu0 }
 0x574   :  { %2372 = vmax.xlane.f32.xlu0 %v4662_v48  ;;  %v4666_v18 = vadd.f32 %v3672_v23, %v3121_v15  ;;  %v1750_v46 = vpop.f32.mrb[45].mxu0 }
 0x575   :  { %v4668_v33 = vadd.f32 %v3673_v42, %v1750_v46 }
 0x577   :  { %1789 = vmax.xlane.f32.xlu1 %v4666_v18 }
 0x578   :  { %1787 = vmax.xlane.f32.xlu0 %v4668_v33 }
 0x5c8   :  { %v2347_v51 = vpop.xlane.xlu1 %2346 }
 0x5c9   :  { %v2377_v45 = vsub.f32 %v4570_v30, %v2347_v51  ;;  %v2345_v31 = vpop.xlane.xlu0 %2344 }
 0x5ca   :  { %v2376_v13 = vsub.f32 %v4572_v27, %v2345_v31 }
 0x5cb   :  { %v2394_v54 = vmul.f32 1.442695, %v2377_v45 }
 0x5cc   :  { %v2392_v63 = vmul.f32 1.442695, %v2376_v13  ;;  %v1762_v38 = vpop.xlane.xlu1 %1761 }
 0x5cd   :  { %3529 = vpow2.f32 %v2394_v54  ;;  %v1792_v56 = vsub.f32 %v4578_v28, %v1762_v38  ;;  %v1760_v17 = vpop.xlane.xlu0 %1759 }
 0x5ce   :  { %3531 = vpow2.f32 %v2392_v63  ;;  %v1791_v21 = vsub.f32 %v4580_v39, %v1760_v17 }
 0x5cf   :  { %v1809_v20 = vmul.f32 1.442695, %v1792_v56 }
 0x5d0   :  { %v1807_v2 = vmul.f32 1.442695, %v1791_v21  ;;  %v2351_v1 = vpop.xlane.xlu1 %2350 }
 0x5d1   :  { %3533 = vpow2.f32 %v1809_v20  ;;  %v2379_v9 = vsub.f32 %v4583_v22, %v2351_v1  ;;  %v2349_v30 = vpop.xlane.xlu0 %2348 }
 0x5d2   :  { %3535 = vpow2.f32 %v1807_v2  ;;  %v2378_v27 = vsub.f32 %v4588_v24, %v2349_v30 }
 0x5d3   :  { %v2398_v11 = vmul.f32 1.442695, %v2379_v9 }
 0x5d4   :  { %v2396_v4 = vmul.f32 1.442695, %v2378_v27  ;;  %v1766_v32 = vpop.xlane.xlu1 %1765 }
 0x5d5   :  { %3537 = vpow2.f32 %v2398_v11  ;;  %v1794_v28 = vsub.f32 %v4593_v19, %v1766_v32  ;;  %v1764_v35 = vpop.xlane.xlu0 %1763 }
 0x5d6   :  { %3539 = vpow2.f32 %v2396_v4  ;;  %v1793_v39 = vsub.f32 %v4595_v40, %v1764_v35 }
 0x5d7   :  { %v4680_v29 = vpop.eup %3529  ;;  %v1813_v34 = vmul.f32 1.442695, %v1794_v28 }
 0x5d8   :  { %v4682_v50 = vpop.eup %3531  ;;  %v1811_v22 = vmul.f32 1.442695, %v1793_v39  ;;  %2426 = vadd.xlane.f32.xlu1 %v4680_v29  ;;  %v2355_v5 = vpop.xlane.xlu1 %2354 }
 0x5d9   :  { %3541 = vpow2.f32 %v1813_v34  ;;  %v2381_v24 = vsub.f32 %v4599_v41, %v2355_v5  ;;  %v2353_v26 = vpop.xlane.xlu0 %2352  ;;  %2424 = vadd.xlane.f32.xlu0 %v4682_v50 }
 0x5da   :  { %3543 = vpow2.f32 %v1811_v22  ;;  %v2380_v19 = vsub.f32 %v4602_v49, %v2353_v26 }
 0x5db   :  { %v4688_v16 = vpop.eup %3533  ;;  %v2402_v40 = vmul.f32 1.442695, %v2381_v24 }
 0x5dc   :  { %v4690_v23 = vpop.eup %3535  ;;  %v2400_v42 = vmul.f32 1.442695, %v2380_v19  ;;  %1841 = vadd.xlane.f32.xlu1 %v4688_v16  ;;  %v1770_v15 = vpop.xlane.xlu1 %1769 }
 0x5dd   :  { %3545 = vpow2.f32 %v2402_v40  ;;  %v1796_v46 = vsub.f32 %v4606_v58, %v1770_v15  ;;  %v1768_v51 = vpop.xlane.xlu0 %1767  ;;  %1839 = vadd.xlane.f32.xlu0 %v4690_v23 }
 0x5de   :  { %3547 = vpow2.f32 %v2400_v42  ;;  %v1795_v41 = vsub.f32 %v4608_v44, %v1768_v51 }
 0x5df   :  { %v4696_v45 = vpop.eup %3537  ;;  %v1817_v49 = vmul.f32 1.442695, %v1796_v46 }
 0x5e0   :  { %v4698_v31 = vpop.eup %3539  ;;  %v1815_v13 = vmul.f32 1.442695, %v1795_v41  ;;  %2430 = vadd.xlane.f32.xlu1 %v4696_v45  ;;  %v2359_v54 = vpop.xlane.xlu1 %2358 }
 0x5e1   :  { %3549 = vpow2.f32 %v1817_v49  ;;  %v2383_v63 = vsub.f32 %v4611_v12, %v2359_v54  ;;  %v2357_v38 = vpop.xlane.xlu0 %2356  ;;  %2428 = vadd.xlane.f32.xlu0 %v4698_v31 }
 0x5e2   :  { %3551 = vpow2.f32 %v1815_v13  ;;  %v2382_v58 = vsub.f32 %v4614_v37, %v2357_v38 }
 0x5e3   :  { %v4704_v56 = vpop.eup %3541  ;;  %v2406_v44 = vmul.f32 1.442695, %v2383_v63 }
 0x5e4   :  { %v4706_v17 = vpop.eup %3543  ;;  %v2404_v21 = vmul.f32 1.442695, %v2382_v58  ;;  %1845 = vadd.xlane.f32.xlu1 %v4704_v56  ;;  %v1774_v20 = vpop.xlane.xlu1 %1773 }
 0x5e5   :  { %3553 = vpow2.f32 %v2406_v44  ;;  %v1798_v2 = vsub.f32 %v4618_v55, %v1774_v20  ;;  %v1772_v1 = vpop.xlane.xlu0 %1771  ;;  %1843 = vadd.xlane.f32.xlu0 %v4706_v17 }
 0x5e6   :  { %3555 = vpow2.f32 %v2404_v21  ;;  %v1797_v12 = vsub.f32 %v4620_v3, %v1772_v1 }
 0x5e7   :  { %v4712_v9 = vpop.eup %3545  ;;  %v1821_v37 = vmul.f32 1.442695, %v1798_v2 }
 0x5e8   :  { %v4714_v30 = vpop.eup %3547  ;;  %v1819_v27 = vmul.f32 1.442695, %v1797_v12  ;;  %2434 = vadd.xlane.f32.xlu1 %v4712_v9  ;;  %v2363_v11 = vpop.xlane.xlu1 %2362 }
 0x5e9   :  { %3557 = vpow2.f32 %v1821_v37  ;;  %v2385_v4 = vsub.f32 %v4623_v0, %v2363_v11  ;;  %v2361_v32 = vpop.xlane.xlu0 %2360  ;;  %2432 = vadd.xlane.f32.xlu0 %v4714_v30 }
 0x5ea   :  { %3559 = vpow2.f32 %v1819_v27  ;;  %v2384_v55 = vsub.f32 %v4626_v62, %v2361_v32 }
 0x5eb   :  { %v4720_v28 = vpop.eup %3549  ;;  %v2410_v3 = vmul.f32 1.442695, %v2385_v4 }
 0x5ec   :  { %v4722_v35 = vpop.eup %3551  ;;  %v2408_v39 = vmul.f32 1.442695, %v2384_v55  ;;  %1849 = vadd.xlane.f32.xlu1 %v4720_v28  ;;  %v1778_v34 = vpop.xlane.xlu1 %1777 }
 0x5ed   :  { %3561 = vpow2.f32 %v2410_v3  ;;  %v1800_v22 = vsub.f32 %v4630_v59, %v1778_v34  ;;  %v1776_v5 = vpop.xlane.xlu0 %1775  ;;  %1847 = vadd.xlane.f32.xlu0 %v4722_v35 }
 0x5ee   :  { %3563 = vpow2.f32 %v2408_v39  ;;  %v1799_v0 = vsub.f32 %v4632_v6, %v1776_v5 }
 0x5ef   :  { %v4728_v24 = vpop.eup %3553  ;;  %v1825_v62 = vmul.f32 1.442695, %v1800_v22 }
 0x5f0   :  { %v4730_v26 = vpop.eup %3555  ;;  %v1823_v19 = vmul.f32 1.442695, %v1799_v0  ;;  %2438 = vadd.xlane.f32.xlu1 %v4728_v24  ;;  %v2367_v40 = vpop.xlane.xlu1 %2366 }
 0x5f1   :  { %3565 = vpow2.f32 %v1825_v62  ;;  %v2387_v42 = vsub.f32 %v4635_v57, %v2367_v40  ;;  %v2365_v15 = vpop.xlane.xlu0 %2364  ;;  %2436 = vadd.xlane.f32.xlu0 %v4730_v26 }
 0x5f2   :  { %3567 = vpow2.f32 %v1823_v19  ;;  %v2386_v59 = vsub.f32 %v4638_v25, %v2365_v15 }
 0x5f3   :  { %v4736_v46 = vpop.eup %3557  ;;  %v2414_v6 = vmul.f32 1.442695, %v2387_v42 }
 0x5f4   :  { %v4738_v51 = vpop.eup %3559  ;;  %v2412_v41 = vmul.f32 1.442695, %v2386_v59  ;;  %1853 = vadd.xlane.f32.xlu1 %v4736_v46  ;;  %v1782_v49 = vpop.xlane.xlu1 %1781 }
 0x5f5   :  { %3569 = vpow2.f32 %v2414_v6  ;;  %v1802_v13 = vsub.f32 %v4642_v61, %v1782_v49  ;;  %v1780_v54 = vpop.xlane.xlu0 %1779  ;;  %1851 = vadd.xlane.f32.xlu0 %v4738_v51 }
 0x5f6   :  { %3571 = vpow2.f32 %v2412_v41  ;;  %v1801_v57 = vsub.f32 %v4644_v60, %v1780_v54 }
 0x5f7   :  { %v4744_v63 = vpop.eup %3561  ;;  %v1829_v25 = vmul.f32 1.442695, %v1802_v13 }
 0x5f8   :  { %v4746_v38 = vpop.eup %3563  ;;  %v1827_v58 = vmul.f32 1.442695, %v1801_v57  ;;  %2442 = vadd.xlane.f32.xlu1 %v4744_v63  ;;  %v2371_v44 = vpop.xlane.xlu1 %2370 }
 0x5f9   :  { %3573 = vpow2.f32 %v1829_v25  ;;  %v2389_v21 = vsub.f32 %v4647_v8, %v2371_v44  ;;  %v2369_v20 = vpop.xlane.xlu0 %2368  ;;  %2440 = vadd.xlane.f32.xlu0 %v4746_v38 }
 0x5fa   :  { %3575 = vpow2.f32 %v1827_v58  ;;  %v2388_v61 = vsub.f32 %v4650_v14, %v2369_v20 }
 0x5fb   :  { %v4752_v2 = vpop.eup %3565  ;;  %v2418_v60 = vmul.f32 1.442695, %v2389_v21 }
 0x5fc   :  { %v4754_v1 = vpop.eup %3567  ;;  %v2416_v12 = vmul.f32 1.442695, %v2388_v61  ;;  %1857 = vadd.xlane.f32.xlu1 %v4752_v2  ;;  %v1786_v37 = vpop.xlane.xlu1 %1785 }
 0x5fd   :  { %3577 = vpow2.f32 %v2418_v60  ;;  %v1804_v27 = vsub.f32 %v4654_v10, %v1786_v37  ;;  %v1784_v11 = vpop.xlane.xlu0 %1783  ;;  %1855 = vadd.xlane.f32.xlu0 %v4754_v1 }
 0x5fe   :  { %3579 = vpow2.f32 %v2416_v12  ;;  %v1803_v8 = vsub.f32 %v4656_v7, %v1784_v11 }
 0x5ff   :  { %v4760_v4 = vpop.eup %3569  ;;  %v1833_v14 = vmul.f32 1.442695, %v1804_v27 }
 0x600   :  { %v4762_v32 = vpop.eup %3571  ;;  %v1831_v55 = vmul.f32 1.442695, %v1803_v8  ;;  %2446 = vadd.xlane.f32.xlu1 %v4760_v4  ;;  %v2375_v3 = vpop.xlane.xlu1 %2374 }
 0x601   :  { %3581 = vpow2.f32 %v1833_v14  ;;  %v2391_v39 = vsub.f32 %v4659_v36, %v2375_v3  ;;  %v2373_v34 = vpop.xlane.xlu0 %2372  ;;  %2444 = vadd.xlane.f32.xlu0 %v4762_v32 }
 0x602   :  { %3583 = vpow2.f32 %v1831_v55  ;;  %v2390_v10 = vsub.f32 %v4662_v48, %v2373_v34 }
 0x603   :  { %v4768_v22 = vpop.eup %3573  ;;  %v2422_v7 = vmul.f32 1.442695, %v2391_v39 }
 0x604   :  { %v4770_v5 = vpop.eup %3575  ;;  %v2420_v0 = vmul.f32 1.442695, %v2390_v10  ;;  %1861 = vadd.xlane.f32.xlu1 %v4768_v22  ;;  %v1790_v62 = vpop.xlane.xlu1 %1789 }
 0x605   :  { %3585 = vpow2.f32 %v2422_v7  ;;  %v1806_v19 = vsub.f32 %v4666_v18, %v1790_v62  ;;  %1859 = vadd.xlane.f32.xlu0 %v4770_v5  ;;  %v1788_v36 = vpop.xlane.xlu0 %1787 }
 0x606   :  { %3587 = vpow2.f32 %v2420_v0  ;;  %v1805_v40 = vsub.f32 %v4668_v33, %v1788_v36 }
 0x607   :  { %v4776_v42 = vpop.eup %3577  ;;  %v1837_v48 = vmul.f32 1.442695, %v1806_v19 }
 0x608   :  { %v4778_v15 = vpop.eup %3579  ;;  %v1835_v59 = vmul.f32 1.442695, %v1805_v40  ;;  %2450 = vadd.xlane.f32.xlu1 %v4776_v42 }
 0x609   :  { %3589 = vpow2.f32 %v1837_v48  ;;  %2448 = vadd.xlane.f32.xlu0 %v4778_v15 }
 0x60a   :  { %3591 = vpow2.f32 %v1835_v59 }
 0x60b   :  { %v4782_v6 = vpop.eup %3581 }
 0x60c   :  { %v4784_v18 = vpop.eup %3583  ;;  %1865 = vadd.xlane.f32.xlu1 %v4782_v6 }
 0x60d   :  { %1863 = vadd.xlane.f32.xlu0 %v4784_v18 }
 0x60f   :  { %v4788_v33 = vpop.eup %3585 }
 0x610   :  { %v4790_v41 = vpop.eup %3587  ;;  %2454 = vadd.xlane.f32.xlu1 %v4788_v33 }
 0x611   :  { %2452 = vadd.xlane.f32.xlu0 %v4790_v41 }
 0x613   :  { %v4794_v49 = vpop.eup %3589 }
 0x614   :  { %v4796_v13 = vpop.eup %3591  ;;  %1869 = vadd.xlane.f32.xlu1 %v4794_v49 }
 0x615   :  { %1867 = vadd.xlane.f32.xlu0 %v4796_v13 }
 0x665   :  { %v2427_v54 = vpop.xlane.xlu1 %2426 }
 0x666   :  { %3593 = vrcp.f32 %v2427_v54  ;;  %v2425_v57 = vpop.xlane.xlu0 %2424 }
 0x667   :  { %3595 = vrcp.f32 %v2425_v57 }
 0x669   :  { %v1842_v25 = vpop.xlane.xlu1 %1841 }
 0x66a   :  { %3597 = vrcp.f32 %v1842_v25  ;;  %v1840_v58 = vpop.xlane.xlu0 %1839 }
 0x66b   :  { %3599 = vrcp.f32 %v1840_v58 }
 0x66d   :  { %v2431_v44 = vpop.xlane.xlu1 %2430 }
 0x66e   :  { %3601 = vrcp.f32 %v2431_v44  ;;  %v2429_v21 = vpop.xlane.xlu0 %2428 }
 0x66f   :  { %3603 = vrcp.f32 %v2429_v21 }
 0x670   :  { %v3594_v20 = vpop.eup %3593 }
 0x671   :  { %v3596_v61 = vpop.eup %3595  ;;  %v1846_v60 = vpop.xlane.xlu1 %1845  ;;  %v2473_v12 = vmul.f32 %v3594_v20, %v4680_v29 }
 0x672   :  { %3605 = vrcp.f32 %v1846_v60  ;;  %v1844_v37 = vpop.xlane.xlu0 %1843  ;;  %v2472_v27 = vmul.f32 %v3596_v61, %v4682_v50 }
 0x673   :  { %3607 = vrcp.f32 %v1844_v37 }
 0x674   :  { %v3598_v11 = vpop.eup %3597  ;;  %v3363_v8 = vpack.c.bf16 %v2473_v12, %v2472_v27 }
 0x675   :  { %v3600_v14 = vpop.eup %3599  ;;  %v2435_v55 = vpop.xlane.xlu1 %2434  ;;  %v1888_v3 = vmul.f32 %v3598_v11, %v4688_v16 }
 0x676   :  { %3609 = vrcp.f32 %v2435_v55  ;;  %v2433_v39 = vpop.xlane.xlu0 %2432  ;;  %3364 = vmatpush3.bf16.xpose.msra.mxu1 %v3363_v8  ;;  %v1887_v34 = vmul.f32 %v3600_v14, %v4690_v23 }
 0x677   :  { %3611 = vrcp.f32 %v2433_v39  ;;  %3365 = vmatprep.subr.bf16.mxu1 %v3890_v47 }
 0x678   :  { %v3602_v29 = vpop.eup %3601  ;;  %v3331_v10 = vpack.c.bf16 %v1888_v3, %v1887_v34 }
 0x679   :  { %v3604_v7 = vpop.eup %3603  ;;  %v1850_v0 = vpop.xlane.xlu1 %1849  ;;  %v2475_v50 = vmul.f32 %v3602_v29, %v4696_v45 }
 0x67a   :  { %3613 = vrcp.f32 %v1850_v0  ;;  %v1848_v62 = vpop.xlane.xlu0 %1847  ;;  %3332 = vmatpush3.bf16.xpose.msra.mxu0 %v3331_v10  ;;  %v2474_v19 = vmul.f32 %v3604_v7, %v4698_v31 }
 0x67b   :  { %3615 = vrcp.f32 %v1848_v62  ;;  %3333 = vmatprep.subr.bf16.mxu0 %v3890_v47 }
 0x67c   :  { %v3606_v16 = vpop.eup %3605  ;;  %v3366_v36 = vpack.c.bf16 %v2475_v50, %v2474_v19 }
 0x67d   :  { %v3608_v23 = vpop.eup %3607  ;;  %v2439_v40 = vpop.xlane.xlu1 %2438  ;;  %v1890_v48 = vmul.f32 %v3606_v16, %v4704_v56 }
 0x67e   :  { %3617 = vrcp.f32 %v2439_v40  ;;  %v2437_v59 = vpop.xlane.xlu0 %2436  ;;  %3367 = vmatpush3.bf16.xpose.msra.mxu1 %v3366_v36  ;;  %v1889_v54 = vmul.f32 %v3608_v23, %v4706_v17 }
 0x67f   :  { %3619 = vrcp.f32 %v2437_v59  ;;  %3368 = vmatprep.subr.bf16.mxu1 %v3890_v47 }
 0x680   :  { %v3610_v45 = vpop.eup %3609  ;;  %v3334_v57 = vpack.c.bf16 %v1890_v48, %v1889_v54 }
 0x681   :  { %v3612_v31 = vpop.eup %3611  ;;  %v1854_v25 = vpop.xlane.xlu1 %1853  ;;  %v2477_v58 = vmul.f32 %v3610_v45, %v4712_v9 }
 0x682   :  { %3621 = vrcp.f32 %v1854_v25  ;;  %v1852_v44 = vpop.xlane.xlu0 %1851  ;;  %3335 = vmatpush3.bf16.xpose.msra.mxu0 %v3334_v57  ;;  %v2476_v21 = vmul.f32 %v3612_v31, %v4714_v30 }
 0x683   :  { %3623 = vrcp.f32 %v1852_v44  ;;  %3336 = vmatprep.subr.bf16.mxu0 %v3890_v47 }
 0x684   :  { %v3614_v56 = vpop.eup %3613  ;;  %v3369_v20 = vpack.c.bf16 %v2477_v58, %v2476_v21 }
 0x685   :  { %v3616_v17 = vpop.eup %3615  ;;  %v2443_v61 = vpop.xlane.xlu1 %2442  ;;  %v1892_v60 = vmul.f32 %v3614_v56, %v4720_v28 }
 0x686   :  { %3625 = vrcp.f32 %v2443_v61  ;;  %v2441_v12 = vpop.xlane.xlu0 %2440  ;;  %3370 = vmatpush3.bf16.xpose.msra.mxu1 %v3369_v20  ;;  %v1891_v37 = vmul.f32 %v3616_v17, %v4722_v35 }
 0x687   :  { %3627 = vrcp.f32 %v2441_v12  ;;  %3371 = vmatprep.subr.bf16.mxu1 %v3890_v47 }
 0x688   :  { %v3618_v9 = vpop.eup %3617  ;;  %v3337_v27 = vpack.c.bf16 %v1892_v60, %v1891_v37 }
 0x689   :  { %v3620_v30 = vpop.eup %3619  ;;  %v1858_v11 = vpop.xlane.xlu1 %1857  ;;  %v2479_v8 = vmul.f32 %v3618_v9, %v4728_v24 }
 0x68a   :  { %3629 = vrcp.f32 %v1858_v11  ;;  %v1856_v14 = vpop.xlane.xlu0 %1855  ;;  %3338 = vmatpush3.bf16.xpose.msra.mxu0 %v3337_v27  ;;  %v2478_v55 = vmul.f32 %v3620_v30, %v4730_v26 }
 0x68b   :  { %3631 = vrcp.f32 %v1856_v14  ;;  %3339 = vmatprep.subr.bf16.mxu0 %v3890_v47 }
 0x68c   :  { %v3622_v28 = vpop.eup %3621  ;;  %v3372_v3 = vpack.c.bf16 %v2479_v8, %v2478_v55 }
 0x68d   :  { %v3624_v35 = vpop.eup %3623  ;;  %v2447_v39 = vpop.xlane.xlu1 %2446  ;;  %v1894_v34 = vmul.f32 %v3622_v28, %v4736_v46 }
 0x68e   :  { %3633 = vrcp.f32 %v2447_v39  ;;  %v2445_v29 = vpop.xlane.xlu0 %2444  ;;  %3373 = vmatpush3.bf16.xpose.msra.mxu1 %v3372_v3  ;;  %v1893_v10 = vmul.f32 %v3624_v35, %v4738_v51  ;;  %v3674_v35 = vld [vmem:[#allocation12] sm:$0xff] }
 0x68f   :  { %3635 = vrcp.f32 %v2445_v29  ;;  %3374 = vmatprep.subr.bf16.mxu1 %v3890_v47 }
 0x690   :  { %v3626_v24 = vpop.eup %3625  ;;  %v3340_v7 = vpack.c.bf16 %v1894_v34, %v1893_v10  ;;  %v3678_v34 = vld [vmem:[#allocation8] sm:$0xff] }
 0x691   :  { %v3628_v26 = vpop.eup %3627  ;;  %v1862_v0 = vpop.xlane.xlu1 %1861  ;;  %v2481_v50 = vmul.f32 %v3626_v24, %v4744_v63 }
 0x692   :  { %3637 = vrcp.f32 %v1862_v0  ;;  %v1860_v62 = vpop.xlane.xlu0 %1859  ;;  %3341 = vmatpush3.bf16.xpose.msra.mxu0 %v3340_v7  ;;  %v2480_v19 = vmul.f32 %v3628_v26, %v4746_v38 }
 0x693   :  { %3639 = vrcp.f32 %v1860_v62  ;;  %3342 = vmatprep.subr.bf16.mxu0 %v3890_v47 }
 0x694   :  { %v3630_v46 = vpop.eup %3629  ;;  %v3375_v16 = vpack.c.bf16 %v2481_v50, %v2480_v19 }
 0x695   :  { %v3632_v51 = vpop.eup %3631  ;;  %v2451_v36 = vpop.xlane.xlu1 %2450  ;;  %v1896_v23 = vmul.f32 %v3630_v46, %v4752_v2 }
 0x696   :  { %3641 = vrcp.f32 %v2451_v36  ;;  %v2449_v40 = vpop.xlane.xlu0 %2448  ;;  %3376 = vmatpush3.bf16.xpose.msra.mxu1 %v3375_v16  ;;  %v1895_v48 = vmul.f32 %v3632_v51, %v4754_v1 }
 0x697   :  { %3643 = vrcp.f32 %v2449_v40  ;;  %3377 = vmatprep.subr.bf16.mxu1 %v3890_v47 }
 0x698   :  { %v3634_v63 = vpop.eup %3633  ;;  %v3343_v59 = vpack.c.bf16 %v1896_v23, %v1895_v48 }
 0x699   :  { %v3636_v38 = vpop.eup %3635  ;;  %v1866_v54 = vpop.xlane.xlu1 %1865  ;;  %v2483_v45 = vmul.f32 %v3634_v63, %v4760_v4 }
 0x69a   :  { %3645 = vrcp.f32 %v1866_v54  ;;  %v1864_v57 = vpop.xlane.xlu0 %1863  ;;  %3344 = vmatpush3.bf16.xpose.msra.mxu0 %v3343_v59  ;;  %v2482_v31 = vmul.f32 %v3636_v38, %v4762_v32 }
 0x69b   :  { %3647 = vrcp.f32 %v1864_v57  ;;  %3345 = vmatprep.subr.bf16.mxu0 %v3890_v47 }
 0x69c   :  { %v3638_v2 = vpop.eup %3637  ;;  %v3378_v25 = vpack.c.bf16 %v2483_v45, %v2482_v31 }
 0x69d   :  { %v3640_v1 = vpop.eup %3639  ;;  %v2455_v58 = vpop.xlane.xlu1 %2454  ;;  %v1898_v44 = vmul.f32 %v3638_v2, %v4768_v22 }
 0x69e   :  { %3649 = vrcp.f32 %v2455_v58  ;;  %v2453_v21 = vpop.xlane.xlu0 %2452  ;;  %3379 = vmatpush3.bf16.xpose.msra.mxu1 %v3378_v25  ;;  %v1897_v56 = vmul.f32 %v3640_v1, %v4770_v5 }
 0x69f   :  { %3651 = vrcp.f32 %v2453_v21  ;;  %3380 = vmatprep.subr.bf16.mxu1 %v3890_v47 }
 0x6a0   :  { %v3642_v4 = vpop.eup %3641  ;;  %v3346_v20 = vpack.c.bf16 %v1898_v44, %v1897_v56 }
 0x6a1   :  { %v3644_v32 = vpop.eup %3643  ;;  %v1870_v17 = vpop.xlane.xlu1 %1869  ;;  %v2485_v61 = vmul.f32 %v3642_v4, %v4776_v42 }
 0x6a2   :  { %3653 = vrcp.f32 %v1870_v17  ;;  %v1868_v60 = vpop.xlane.xlu0 %1867  ;;  %3347 = vmatpush3.bf16.xpose.msra.mxu0 %v3346_v20  ;;  %v2484_v12 = vmul.f32 %v3644_v32, %v4778_v15 }
 0x6a3   :  { %3655 = vrcp.f32 %v1868_v60  ;;  %3348 = vmatprep.subr.bf16.mxu0 %v3890_v47 }
 0x6a4   :  { %v3646_v22 = vpop.eup %3645  ;;  %v3381_v37 = vpack.c.bf16 %v2485_v61, %v2484_v12 }
 0x6a5   :  { %v3648_v5 = vpop.eup %3647  ;;  %v1900_v9 = vmul.f32 %v3646_v22, %v4782_v6 }
 0x6a6   :  { %3382 = vmatpush3.bf16.xpose.msra.mxu1 %v3381_v37  ;;  %v1899_v27 = vmul.f32 %v3648_v5, %v4784_v18 }
 0x6a7   :  { %3383 = vmatprep.subr.bf16.mxu1 %v3890_v47 }
 0x6a8   :  { %v3650_v30 = vpop.eup %3649  ;;  %v3349_v42 = vpack.c.bf16 %v1900_v9, %v1899_v27 }
 0x6a9   :  { %v3652_v11 = vpop.eup %3651  ;;  %v2487_v8 = vmul.f32 %v3650_v30, %v4788_v33  ;;  %v3675_v33 = vld [vmem:[#allocation12 + $0x8] sm:$0xff] }
 0x6aa   :  { %3350 = vmatpush3.bf16.xpose.msra.mxu0 %v3349_v42  ;;  %v2486_v15 = vmul.f32 %v3652_v11, %v4790_v41  ;;  %v3677_v41 = vld [vmem:[#allocation12 + $0x18] sm:$0xff] }
 0x6ab   :  { %3351 = vmatprep.subr.bf16.mxu0 %v3890_v47  ;;  %v3676_v47 = vld [vmem:[#allocation12 + $0x10] sm:$0xff] }
 0x6ac   :  { %v3654_v14 = vpop.eup %3653  ;;  %v3384_v55 = vpack.c.bf16 %v2487_v8, %v2486_v15 }
 0x6ad   :  { %v3656_v28 = vpop.eup %3655  ;;  %v1902_v6 = vmul.f32 %v3654_v14, %v4794_v49  ;;  %v2488_v49 = vrot.slane %v4167_v52, 4 }
 0x6ae   :  { %3385 = vmatpush3.bf16.xpose.msra.mxu1 %v3384_v55  ;;  %v1901_v18 = vmul.f32 %v3656_v28, %v4796_v13  ;;  %v1903_v13 = vrot.slane %v4169_v53, 4 }
 0x6b0   :  { %v3352_v3 = vpack.c.bf16 %v1902_v6, %v1901_v18 }
 0x6b2   :  { %3353 = vmatpush3.bf16.xpose.msra.mxu0 %v3352_v3 }
 0x6b5   :  { %3236 = vmatmul.mubr.f32.vlgmr.msra.gmra.mrb[42].mxu1 %v3674_v35 }
 0x6b6   :  { %3238 = vmatprep.mubr.msk.f32.mxu1 %vm3891_vm4, %v3892_v43 }
 0x6b9   :  { %3155 = vmatmul.mubr.f32.vlgmr.msra.gmra.mrb[46].mxu0 %v3674_v35  ;;  %3239 = vmatmul.mubr.f32.gmra.mrb[44].mxu1 %v3675_v33 }
 0x6ba   :  { %3157 = vmatprep.mubr.msk.f32.mxu0 %vm3891_vm4, %v3892_v43  ;;  %3241 = vmatprep.mubr.msk.f32.mxu1 %vm3891_vm4, %v3892_v43 }
 0x6bd   :  { %3158 = vmatmul.mubr.f32.gmra.mrb[48].mxu0 %v3675_v33  ;;  %3242 = vmatmul.mubr.f32.gmra.mrb[46].mxu1 %v3676_v47 }
 0x6be   :  { %3160 = vmatprep.mubr.msk.f32.mxu0 %vm3891_vm4, %v3892_v43  ;;  %3244 = vmatprep.mubr.msk.f32.mxu1 %vm3891_vm4, %v3892_v43 }
 0x6c1   :  { %3161 = vmatmul.mubr.f32.gmra.mrb[50].mxu0 %v3676_v47  ;;  %3245 = vmatmul.mubr.f32.gmra.mrb[48].mxu1 %v3677_v41 }
 0x6c2   :  { %3163 = vmatprep.mubr.msk.f32.mxu0 %vm3891_vm4, %v3892_v43  ;;  %3247 = vmatprep.mubr.msk.f32.mxu1 %vm3891_vm4, %v3892_v43 }
 0x6c5   :  { %3164 = vmatmul.mubr.f32.gmra.mrb[52].mxu0 %v3677_v41  ;;  %3248 = vmatmul.mubr.f32.gmra.mrb[50].mxu1 %v2488_v49 }
 0x6c6   :  { %3166 = vmatprep.mubr.msk.f32.mxu0 %vm3891_vm4, %v3892_v43 }
 0x6c9   :  { %3167 = vmatmul.mubr.f32.gmra.mrb[54].mxu0 %v1903_v13 }
 0x788   :  { %v2556_v39 = vpop.f32.mrb[42].mxu1 }
 0x789   :  { %v2580_v29 = vmul.f32 %v3678_v34, %v2556_v39  ;;  %v3237_v10 = vpop.f32.mrb[43].mxu1 }
 0x78b   :  { %v2584_v24 = vrot.slane %v2580_v29, 4 }
 0x78c   :  { %v1971_v7 = vpop.f32.mrb[46].mxu0  ;;  %v2561_v26 = vpop.f32.mrb[44].mxu1 }
 0x78d   :  { %v2585_v0 = vadd.f32 %v2584_v24, %v2580_v29  ;;  %v1995_v50 = vmul.f32 %v3678_v34, %v1971_v7  ;;  %v2581_v62 = vmul.f32 %v3678_v34, %v2561_v26  ;;  %v3156_v19 = vpop.f32.mrb[47].mxu0  ;;  %v3240_v52 = vpop.f32.mrb[45].mxu1 }
 0x78f   :  { %v2586_v46 = vrot.slane %v2585_v0, 2  ;;  %v1999_v16 = vrot.slane %v1995_v50, 4  ;;  %v2590_v51 = vrot.slane %v2581_v62, 4 }
 0x790   :  { %v1976_v36 = vpop.f32.mrb[48].mxu0  ;;  %v2566_v43 = vpop.f32.mrb[46].mxu1 }
 0x791   :  { %v2587_v23 = vadd.f32 %v2586_v46, %v2585_v0  ;;  %v2000_v53 = vadd.f32 %v1999_v16, %v1995_v50  ;;  %v2591_v40 = vadd.f32 %v2590_v51, %v2581_v62  ;;  %v1996_v48 = vmul.f32 %v3678_v34, %v1976_v36  ;;  %v3159_v63 = vpop.f32.mrb[49].mxu0  ;;  %v3243_v59 = vpop.f32.mrb[47].mxu1 }
 0x792   :  { %v2582_v38 = vmul.f32 %v3678_v34, %v2566_v43 }
 0x793   :  { %v2001_v54 = vrot.slane %v2000_v53, 2  ;;  %v2592_v45 = vrot.slane %v2591_v40, 2  ;;  %v2005_v57 = vrot.slane %v1996_v48, 4  ;;  %v2588_v31 = vrot.slane %v2587_v23, 1 }
 0x794   :  { %v2596_v2 = vrot.slane %v2582_v38, 4  ;;  %v1981_v25 = vpop.f32.mrb[50].mxu0  ;;  %v2571_v1 = vpop.f32.mrb[48].mxu1 }
 0x795   :  { %v2002_v58 = vadd.f32 %v2001_v54, %v2000_v53  ;;  %v2593_v44 = vadd.f32 %v2592_v45, %v2591_v40  ;;  %v2006_v21 = vadd.f32 %v2005_v57, %v1996_v48  ;;  %v3162_v56 = vpop.f32.mrb[51].mxu0  ;;  %v3246_v4 = vpop.f32.mrb[49].mxu1  ;;  %v1997_v32 = vmul.f32 %v3678_v34, %v1981_v25 }
 0x796   :  { %v2597_v20 = vadd.f32 %v2596_v2, %v2582_v38  ;;  %v2583_v17 = vmul.f32 %v3678_v34, %v2571_v1  ;;  %v2589_v12 = vadd.f32 %v2588_v31, %v2587_v23 }
 0x797   :  { %v2594_v61 = vrot.slane %v2593_v44, 1  ;;  %v2007_v60 = vrot.slane %v2006_v21, 2  ;;  %v2011_v37 = vrot.slane %v1997_v32, 4  ;;  %v2003_v30 = vrot.slane %v2002_v58, 1 }
 0x798   :  { %v2598_v22 = vrot.slane %v2597_v20, 2  ;;  %v2602_v5 = vrot.slane %v2583_v17, 4  ;;  %v1986_v9 = vpop.f32.mrb[52].mxu0  ;;  %v2576_v27 = vpop.f32.mrb[50].mxu1 }
 0x799   :  { %v2595_v42 = vadd.f32 %v2594_v61, %v2593_v44  ;;  %v2008_v11 = vadd.f32 %v2007_v60, %v2006_v21  ;;  %v1998_v8 = vmul.f32 %v3678_v34, %v1986_v9  ;;  %v3165_v15 = vpop.f32.mrb[53].mxu0  ;;  %v3249_v14 = vpop.f32.mrb[51].mxu1  ;;  %v2012_v28 = vadd.f32 %v2011_v37, %v1997_v32 }
 0x79a   :  { %v2599_v55 = vadd.f32 %v2598_v22, %v2597_v20  ;;  %v2603_v6 = vadd.f32 %v2602_v5, %v2583_v17  ;;  %v2004_v13 = vadd.f32 %v2003_v30, %v2002_v58 }
 0x79b   :  { %v2009_v18 = vrot.slane %v2008_v11, 1  ;;  %v2017_v3 = vrot.slane %v1998_v8, 4  ;;  %v2612_v35 = vsel %vm854_vm5, %v2595_v42, %v2589_v12  ;;  %v2013_v47 = vrot.slane %v2012_v28, 2 }
 0x79c   :  { %v2600_v33 = vrot.slane %v2599_v55, 1  ;;  %v2604_v41 = vrot.slane %v2603_v6, 2  ;;  %v1991_v49 = vpop.f32.mrb[54].mxu0 }
 0x79d   :  { %v2010_v39 = vadd.f32 %v2009_v18, %v2008_v11  ;;  %v2018_v29 = vadd.f32 %v2017_v3, %v1998_v8  ;;  %v3168_v10 = vpop.f32.mrb[55].mxu0  ;;  %v2014_v7 = vadd.f32 %v2013_v47, %v2012_v28 }
 0x79e   :  { %v2601_v24 = vadd.f32 %v2600_v33, %v2599_v55  ;;  %v2605_v34 = vadd.f32 %v2604_v41, %v2603_v6 }
 0x79f   :  { %v2019_v26 = vrot.slane %v2018_v29, 2  ;;  %v2027_v0 = vsel %vm854_vm5, %v2010_v39, %v2004_v13  ;;  %v2015_v50 = vrot.slane %v2014_v7, 1 }
 0x7a0   :  { %v2606_v62 = vrot.slane %v2605_v34, 1  ;;  %v2613_v19 = vsel %vm856_vm6, %v2601_v24, %v2612_v35 }
 0x7a1   :  { %v2020_v52 = vadd.f32 %v2019_v26, %v2018_v29  ;;  %v2016_v46 = vadd.f32 %v2015_v50, %v2014_v7 }
 0x7a2   :  { %v2607_v16 = vadd.f32 %v2606_v62, %v2605_v34 }
 0x7a3   :  { %v2021_v51 = vrot.slane %v2020_v52, 1  ;;  %v2028_v43 = vsel %vm856_vm6, %v2016_v46, %v2027_v0 }
 0x7a4   :  { %v2614_v36 = vsel %vm858_vm7, %v2607_v16, %v2613_v19 }
 0x7a5   :  { %v2616_v23 = vadd.f32 %v2614_v36, %v2576_v27  ;;  %v2022_v53 = vadd.f32 %v2021_v51, %v2020_v52 }
 0x7a7   :  { %v2029_v40 = vsel %vm858_vm7, %v2022_v53, %v2028_v43  ;;  %v2621_v48 = vrot.slane %v2616_v23, 4 }
 0x7a8   :  { %v2031_v63 = vadd.f32 %v2029_v40, %v1991_v49 }
 0x7aa   :  { %v2625_v59 = vsel %vm2623_vm8, %v2031_v63, %v2621_v48 }
 0x7ab   :  { %2627 = vst [vmem:[#allocation16 + $0x8] sm:$0xff] %v2625_v59 }
 0x7ac   :  { %3856 = shalt.err (!%p3853_p9)
}
 0x7ad   :  { %s3857_s19 = scalar_lea.hbm %s4894_s8, 256 }
 0x7ae   :  { %p3858_p10 = scmp.ne.s32.totalorder %s4894_s8, %s3857_s19  ;;  %p3861_p11 = scmp.lt.u32.totalorder %s3857_s19, %s4894_s8 }
 0x7b0   :  { %p3863_p12 = pnand %p3861_p11, %p3858_p10 }
 0x7b2   :  { %3866 = shalt.err (!%p3863_p12)
}
 0x7b3   :  { %2639 = dma.vmem_to_hbm [thread:$0]  %s2634_s11, 256, %s4894_s8, [#allocation4], %s3881_s17, %s3881_s17, %s3882_s18  }
 0x7b4   :  { %3877 = dma.done.wait [#allocation4], 256  }
 0x7b5   :  { %3878 = vsyncadd [#allocation4], 4294967040 }
 0x7b6   :  { %2643 = vsyncpa [#allocation3], 1 }
 0x7b7   :  { %2644 = vsyncpa [#allocation7], 1 }
 0x7b8   :  { %2645 = vsyncpa [#allocation10], 1 }
 0x7b9   :  { %2646 = vsyncpa [#allocation13], 1 }
 0x7ba   :  { %2647 = vsyncpa [#allocation4], 1 }
 0x7bb   :  { %2648 = vsyncpa [#allocation5], 1 }

</bundles_post_ra>
